<compile_context>
chip_gen: v6e
topology: v6e:2x2x1
jax: 0.10.0
libtpu: 0.0.40
codegen_flags: <defaults>
</compile_context>

<pallas_src>
import functools

import jax
import jax.numpy as jnp
from jax import lax
from jax.experimental import pallas as pl
from jax.experimental.pallas import tpu as pltpu


def _nonlocal_kernel(x_ref, w_ref, b_ref, o_ref, *, c_out, h, w):
    # x_ref:  (Bt, C_in, H*W)   lane-dense input slab
    # w_ref:  (3*C_out, C_in)   fused [wq; wk; wv]
    # b_ref:  (3*C_out, 1)      fused [bq; bk; bv]
    # o_ref:  (Bt, C_out, H*W)  lane-dense output slab
    bt = x_ref.shape[0]
    hw = h * w

    wts = w_ref[...]                              # keep native dtype for MXU
    # Hoisted, loop-invariant f32 bias broadcast (JAX does not CSE
    # broadcast_in_dim, so keep it outside the per-batch loop).
    bias = lax.broadcast_in_dim(
        b_ref[...].astype(jnp.float32), (3 * c_out, hw), (0, 1))
    # bf16 operands stay bf16 on the MXU (f32 accumulation); f32 stays f32.
    mxu_dtype = jnp.bfloat16 if x_ref.dtype == jnp.bfloat16 else jnp.float32

    for bi in range(bt):  # Bt is small by construction -> short static unroll
        xf = x_ref[bi]                                            # (C_in, HW)

        # Fused q/k/v 1x1 convs: a single MXU matmul, f32 accumulation.
        qkv = jnp.dot(wts, xf, preferred_element_type=jnp.float32) + bias
        q = qkv[0 * c_out:1 * c_out].reshape(c_out, h, w)
        k = qkv[1 * c_out:2 * c_out].reshape(c_out, h, w)
        v = qkv[2 * c_out:3 * c_out].reshape(c_out, h, w)

        # Per-channel spatial matmul: s[c] = q[c] @ k[c]   (needs H == W).
        s = jnp.einsum('chw,cwn->chn',
                       q.astype(mxu_dtype), k.astype(mxu_dtype),
                       preferred_element_type=jnp.float32)

        # Numerically-stable softmax(s, -1) * v. The divide is an EUP
        # reciprocal of the small (C_out, H, 1) row-sum; no materialized
        # probability tensor.
        s = s - jnp.max(s, axis=-1, keepdims=True)
        e = jnp.exp(s)
        inv_l = pl.reciprocal(jnp.sum(e, axis=-1, keepdims=True), approx=True)
        o = (e * v) * inv_l                                       # (C_out, H, W)

        o_ref[bi] = o.reshape(c_out, hw).astype(o_ref.dtype)      # lane-dense store


def _pick_batch_tile(b, c_in, c_out, hw, in_itemsize, out_itemsize,
                     budget_bytes=6 * 1024 * 1024, max_bt=8):
    """Largest Bt (<= max_bt) dividing B whose per-step working set fits a
    conservative VMEM budget (safe under v7x's smaller VMEM and the default
    scoped limits), while keeping the in-kernel static unroll short."""
    per_elem = (2 * c_in * hw * in_itemsize         # x block (double-buffered)
                + 3 * c_out * hw * 4                # fused qkv (f32)
                + 3 * c_out * hw * 4                # s / e / o temporaries (f32)
                + 2 * c_out * hw * out_itemsize)    # out block (double-buffered)
    bt = 1
    for d in range(1, min(b, max_bt) + 1):
        if b % d == 0 and d * per_elem <= budget_bytes:
            bt = d
    return bt


def nonlocal_conv2d(x, wq, bq, wk, bk, wv, bv):
    B, C_in, H, W = x.shape
    C_out = wq.shape[0]
    assert H == W, "reference `q @ k` requires square spatial dims"
    HW = H * W

    # Fuse the three 1x1-conv params -> one weight DMA, one MXU matmul/step.
    w_qkv = jnp.concatenate([wq, wk, wv], axis=0)                 # (3*C_out, C_in)
    b_qkv = jnp.concatenate([bq, bk, bv], axis=0).reshape(3 * C_out, 1)

    # Lane-dense (B, C, H*W) slabs; contiguous reshape in HBM (free).
    x_flat = x.reshape(B, C_in, HW)

    Bt = _pick_batch_tile(B, C_in, C_out, HW,
                          x.dtype.itemsize, x.dtype.itemsize)

    kernel = functools.partial(_nonlocal_kernel, c_out=C_out, h=H, w=W)

    out_flat = pl.pallas_call(
        kernel,
        out_shape=jax.ShapeDtypeStruct((B, C_out, HW), x.dtype),
        grid_spec=pltpu.PrefetchScalarGridSpec(
            num_scalar_prefetch=0,
            grid=(B // Bt,),
            in_specs=[
                pl.BlockSpec((Bt, C_in, HW), lambda b: (b, 0, 0)),
                pl.BlockSpec((3 * C_out, C_in), lambda b: (0, 0)),
                pl.BlockSpec((3 * C_out, 1), lambda b: (0, 0)),
            ],
            out_specs=pl.BlockSpec((Bt, C_out, HW), lambda b: (b, 0, 0)),
        ),
        compiler_params=pltpu.CompilerParams(
            dimension_semantics=("parallel",),
            vmem_limit_bytes=32 * 1024 * 1024),
    )(x_flat, w_qkv, b_qkv)

    return out_flat.reshape(B, C_out, H, W)


def _reference(x, wq, bq, wk, bk, wv, bv):
    def conv(w, b):
        return jnp.einsum('oc,bchw->bohw', w, x) + b[None, :, None, None]
    q = conv(wq, bq)
    k = conv(wk, bk)
    v = conv(wv, bv)
    s = jnp.einsum('bchw,bcwn->bchn', q, k)
    return jax.nn.softmax(s, axis=-1) * v


if __name__ == "__main__":
    B, C_in, C_out, H, W = 2, 4, 8, 16, 16

    key = jax.random.PRNGKey(0)
    kx, kq, kk, kv, kbq, kbk, kbv = jax.random.split(key, 7)

    x = jax.random.normal(kx, (B, C_in, H, W), dtype=jnp.float32)
    # nn.Conv2d weight (C_out, C_in, 1, 1) squeezed to (C_out, C_in); bias (C_out,).
    wq = 0.1 * jax.random.normal(kq, (C_out, C_in), dtype=jnp.float32)
    wk = 0.1 * jax.random.normal(kk, (C_out, C_in), dtype=jnp.float32)
    wv = 0.1 * jax.random.normal(kv, (C_out, C_in), dtype=jnp.float32)
    bq = 0.1 * jax.random.normal(kbq, (C_out,), dtype=jnp.float32)
    bk = 0.1 * jax.random.normal(kbk, (C_out,), dtype=jnp.float32)
    bv = 0.1 * jax.random.normal(kbv, (C_out,), dtype=jnp.float32)

    out = nonlocal_conv2d(x, wq, bq, wk, bk, wv, bv)
    out = jax.block_until_ready(out)

    ref = _reference(x, wq, bq, wk, bk, wv, bv)
    assert out.shape == (B, C_out, H, W)
    # Tolerance accounts for the EUP approximate reciprocal in the softmax
    # normalization (relative error << 1e-2); all other math is exact f32.
    assert jnp.allclose(out, ref, atol=1e-2, rtol=1e-2), "mismatch vs JAX reference"

    print("KERNEL_OK")
</pallas_src>

<mosaic_0001>
module attributes {stable_mosaic.version = 11 : i64} {
  func.func @_nonlocal_kernel(%arg0: i32, %arg1: memref<2x4x256xf32, #tpu.memory_space<vmem>>, %arg2: memref<24x4xf32, #tpu.memory_space<vmem>>, %arg3: memref<24x1xf32, #tpu.memory_space<vmem>>, %arg4: memref<2x8x256xf32, #tpu.memory_space<vmem>>) attributes {dimension_semantics = [#tpu.dimension_semantics<parallel>], iteration_bounds = array<i64: 1>, scalar_prefetch = 0 : i64, scratch_operands = 0 : i64, tpu.core_type = #tpu.core_type<tc>, window_params = [{transform_indices = @transform_0, window_bounds = array<i64: 2, 4, 256>}, {pipeline_mode = #tpu.pipeline_mode<synchronous>, transform_indices = @transform_1, window_bounds = array<i64: 24, 4>}, {pipeline_mode = #tpu.pipeline_mode<synchronous>, transform_indices = @transform_2, window_bounds = array<i64: 24, 1>}, {transform_indices = @transform_3, window_bounds = array<i64: 2, 8, 256>}]} {
    %c0 = arith.constant 0 : index
    %c0_0 = arith.constant 0 : index
    %0 = vector.load %arg2[%c0, %c0_0] : memref<24x4xf32, #tpu.memory_space<vmem>>, vector<24x4xf32>
    %c0_1 = arith.constant 0 : index
    %c0_2 = arith.constant 0 : index
    %1 = vector.load %arg3[%c0_1, %c0_2] : memref<24x1xf32, #tpu.memory_space<vmem>>, vector<24x1xf32>
    %2 = vector.shape_cast %1 : vector<24x1xf32> to vector<24x1xf32>
    %3 = vector.broadcast %2 : vector<24x1xf32> to vector<24x256xf32>
    %c0_3 = arith.constant 0 : index
    %c0_4 = arith.constant 0 : index
    %c0_5 = arith.constant 0 : index
    %4 = vector.load %arg1[%c0_3, %c0_4, %c0_5] : memref<2x4x256xf32, #tpu.memory_space<vmem>>, vector<1x4x256xf32>
    %5 = vector.shape_cast %4 : vector<1x4x256xf32> to vector<4x256xf32>
    %cst = arith.constant dense<0.000000e+00> : vector<24x256xf32>
    %6 = tpu.matmul %0, %5, %cst {dimension_numbers = #tpu.dot_dimension_numbers<[1], [0], [0], [1], [0, 0, 1, 1], [], []>} : vector<24x4xf32>, vector<4x256xf32>, vector<24x256xf32> -> vector<24x256xf32>
    %7 = arith.addf %6, %3 : vector<24x256xf32>
    %8 = vector.extract_strided_slice %7 {offsets = [0, 0], sizes = [8, 256], strides = [1, 1]} : vector<24x256xf32> to vector<8x256xf32>
    %9 = vector.shape_cast %8 : vector<8x256xf32> to vector<8x16x16xf32>
    %10 = vector.extract_strided_slice %7 {offsets = [8, 0], sizes = [8, 256], strides = [1, 1]} : vector<24x256xf32> to vector<8x256xf32>
    %11 = vector.shape_cast %10 : vector<8x256xf32> to vector<8x16x16xf32>
    %12 = vector.extract_strided_slice %7 {offsets = [16, 0], sizes = [8, 256], strides = [1, 1]} : vector<24x256xf32> to vector<8x256xf32>
    %13 = vector.shape_cast %12 : vector<8x256xf32> to vector<8x16x16xf32>
    "tpu.trace_start"() <{level = 10 : i32, message = "chw,cwn->chn"}> : () -> ()
    %cst_6 = arith.constant dense<0.000000e+00> : vector<8x16x16xf32>
    %14 = tpu.matmul %9, %11, %cst_6 {dimension_numbers = #tpu.dot_dimension_numbers<[2], [1], [1], [2], [0, 0, 0, 1, 1, 2], [0], [0]>} : vector<8x16x16xf32>, vector<8x16x16xf32>, vector<8x16x16xf32> -> vector<8x16x16xf32>
    "tpu.trace_stop"() : () -> ()
    %cst_7 = arith.constant dense<0xFF800000> : vector<8x16xf32>
    %15 = vector.multi_reduction <maximumf>, %14, %cst_7 [2] : vector<8x16x16xf32> to vector<8x16xf32>
    %16 = vector.shape_cast %15 : vector<8x16xf32> to vector<8x16x1xf32>
    %17 = vector.broadcast %16 : vector<8x16x1xf32> to vector<8x16x16xf32>
    %18 = arith.subf %14, %17 : vector<8x16x16xf32>
    %19 = math.exp %18 : vector<8x16x16xf32>
    %cst_8 = arith.constant dense<0.000000e+00> : vector<8x16xf32>
    %20 = vector.multi_reduction <add>, %19, %cst_8 [2] : vector<8x16x16xf32> to vector<8x16xf32>
    %21 = vector.shape_cast %20 : vector<8x16xf32> to vector<8x16x1xf32>
    %22 = tpu.reciprocal %21 {approx = true} : vector<8x16x1xf32> -> vector<8x16x1xf32>
    %23 = arith.mulf %19, %13 : vector<8x16x16xf32>
    %24 = vector.broadcast %22 : vector<8x16x1xf32> to vector<8x16x16xf32>
    %25 = arith.mulf %23, %24 : vector<8x16x16xf32>
    %26 = vector.shape_cast %25 : vector<8x16x16xf32> to vector<8x256xf32>
    %c0_9 = arith.constant 0 : index
    %c0_10 = arith.constant 0 : index
    %c0_11 = arith.constant 0 : index
    %27 = vector.load %arg4[%c0_9, %c0_10, %c0_11] : memref<2x8x256xf32, #tpu.memory_space<vmem>>, vector<1x8x256xf32>
    %28 = vector.shape_cast %27 : vector<1x8x256xf32> to vector<8x256xf32>
    %29 = vector.shape_cast %26 : vector<8x256xf32> to vector<1x8x256xf32>
    tpu.vector_store %arg4[%c0_9, %c0_10, %c0_11], %29 {strides = array<i32>} : memref<2x8x256xf32, #tpu.memory_space<vmem>>, vector<1x8x256xf32>,
    %c1 = arith.constant 1 : index
    %c0_12 = arith.constant 0 : index
    %c0_13 = arith.constant 0 : index
    %30 = vector.load %arg1[%c1, %c0_12, %c0_13] : memref<2x4x256xf32, #tpu.memory_space<vmem>>, vector<1x4x256xf32>
    %31 = vector.shape_cast %30 : vector<1x4x256xf32> to vector<4x256xf32>
    %cst_14 = arith.constant dense<0.000000e+00> : vector<24x256xf32>
    %32 = tpu.matmul %0, %31, %cst_14 {dimension_numbers = #tpu.dot_dimension_numbers<[1], [0], [0], [1], [0, 0, 1, 1], [], []>} : vector<24x4xf32>, vector<4x256xf32>, vector<24x256xf32> -> vector<24x256xf32>
    %33 = arith.addf %32, %3 : vector<24x256xf32>
    %34 = vector.extract_strided_slice %33 {offsets = [0, 0], sizes = [8, 256], strides = [1, 1]} : vector<24x256xf32> to vector<8x256xf32>
    %35 = vector.shape_cast %34 : vector<8x256xf32> to vector<8x16x16xf32>
    %36 = vector.extract_strided_slice %33 {offsets = [8, 0], sizes = [8, 256], strides = [1, 1]} : vector<24x256xf32> to vector<8x256xf32>
    %37 = vector.shape_cast %36 : vector<8x256xf32> to vector<8x16x16xf32>
    %38 = vector.extract_strided_slice %33 {offsets = [16, 0], sizes = [8, 256], strides = [1, 1]} : vector<24x256xf32> to vector<8x256xf32>
    %39 = vector.shape_cast %38 : vector<8x256xf32> to vector<8x16x16xf32>
    "tpu.trace_start"() <{level = 10 : i32, message = "chw,cwn->chn"}> : () -> ()
    %cst_15 = arith.constant dense<0.000000e+00> : vector<8x16x16xf32>
    %40 = tpu.matmul %35, %37, %cst_15 {dimension_numbers = #tpu.dot_dimension_numbers<[2], [1], [1], [2], [0, 0, 0, 1, 1, 2], [0], [0]>} : vector<8x16x16xf32>, vector<8x16x16xf32>, vector<8x16x16xf32> -> vector<8x16x16xf32>
    "tpu.trace_stop"() : () -> ()
    %cst_16 = arith.constant dense<0xFF800000> : vector<8x16xf32>
    %41 = vector.multi_reduction <maximumf>, %40, %cst_16 [2] : vector<8x16x16xf32> to vector<8x16xf32>
    %42 = vector.shape_cast %41 : vector<8x16xf32> to vector<8x16x1xf32>
    %43 = vector.broadcast %42 : vector<8x16x1xf32> to vector<8x16x16xf32>
    %44 = arith.subf %40, %43 : vector<8x16x16xf32>
    %45 = math.exp %44 : vector<8x16x16xf32>
    %cst_17 = arith.constant dense<0.000000e+00> : vector<8x16xf32>
    %46 = vector.multi_reduction <add>, %45, %cst_17 [2] : vector<8x16x16xf32> to vector<8x16xf32>
    %47 = vector.shape_cast %46 : vector<8x16xf32> to vector<8x16x1xf32>
    %48 = tpu.reciprocal %47 {approx = true} : vector<8x16x1xf32> -> vector<8x16x1xf32>
    %49 = arith.mulf %45, %39 : vector<8x16x16xf32>
    %50 = vector.broadcast %48 : vector<8x16x1xf32> to vector<8x16x16xf32>
    %51 = arith.mulf %49, %50 : vector<8x16x16xf32>
    %52 = vector.shape_cast %51 : vector<8x16x16xf32> to vector<8x256xf32>
    %c1_18 = arith.constant 1 : index
    %c0_19 = arith.constant 0 : index
    %c0_20 = arith.constant 0 : index
    %53 = vector.load %arg4[%c1_18, %c0_19, %c0_20] : memref<2x8x256xf32, #tpu.memory_space<vmem>>, vector<1x8x256xf32>
    %54 = vector.shape_cast %53 : vector<1x8x256xf32> to vector<8x256xf32>
    %55 = vector.shape_cast %52 : vector<8x256xf32> to vector<1x8x256xf32>
    tpu.vector_store %arg4[%c1_18, %c0_19, %c0_20], %55 {strides = array<i32>} : memref<2x8x256xf32, #tpu.memory_space<vmem>>, vector<1x8x256xf32>,
    return
  }
  func.func @transform_0(%arg0: i32) -> (i32, i32, i32) {
    %c0_i32 = arith.constant 0 : i32
    %c0_i32_0 = arith.constant 0 : i32
    %c0_i32_1 = arith.constant 0 : i32
    return %arg0, %c0_i32, %c0_i32_0 : i32, i32, i32
  }
  func.func @transform_1(%arg0: i32) -> (i32, i32) {
    %c0_i32 = arith.constant 0 : i32
    %c0_i32_0 = arith.constant 0 : i32
    %c0_i32_1 = arith.constant 0 : i32
    return %c0_i32, %c0_i32_0 : i32, i32
  }
  func.func @transform_2(%arg0: i32) -> (i32, i32) {
    %c0_i32 = arith.constant 0 : i32
    %c0_i32_0 = arith.constant 0 : i32
    %c0_i32_1 = arith.constant 0 : i32
    return %c0_i32, %c0_i32_0 : i32, i32
  }
  func.func @transform_3(%arg0: i32) -> (i32, i32, i32) {
    %c0_i32 = arith.constant 0 : i32
    %c0_i32_0 = arith.constant 0 : i32
    %c0_i32_1 = arith.constant 0 : i32
    return %arg0, %c0_i32, %c0_i32_0 : i32, i32, i32
  }
}

</mosaic_0001>

<bundles_post_ra>
// kernel: tpu_custom_call.1
= control target key start
LH: loop header
LB: loop body
LE: loop exit
PB: predicated region body
PF: predicated region fallthrough
CT: control target
= control target key end

     0   :  { %vm49_vm0 = vcmask 1043456   ;;  %v4901_v2 = vmov 0.0   ;;  %s6602_s0 = inlined_call_operand.vmem [shape: f32[2,4,256], index: 0, kind: input, shape index: {}]   ;;  %s6603_s1 = inlined_call_operand.vmem [shape: f32[24,4], index: 1, kind: input, shape index: {}]   ;;  %s6604_s2 = inlined_call_operand.vmem [shape: f32[24,1], index: 2, kind: input, shape index: {}]   ;;  %s6605_s3 = inlined_call_operand.hbm [shape: f32[2,8,256], index: 3, kind: output, shape index: {}]  }
   0x1   :  { %v36_v0 = vld [vmem:[%s6602_s0] sm:$0xff]  ;;  %118 = vmatprep.mubr.f32.mxu0 %v4901_v2  ;;  %v19_v3 = vld [vmem:[%s6604_s2 + $0x8] sm:$0xff] }
   0x2   :  { %v38_v1 = vcombine.high %v36_v0, %v36_v0 }
   0x3   :  { %8 = vsyncpa [#allocation3], 0  ;;  %v4944_v4 = vld [vmem:[%s6603_s1] sm:$0xff]  ;;  %vm39_vm1 = vcmask 31744   ;;  %v4902_v5 = vmov 0   ;;  %v4957_v7 = vld [vmem:[%s6603_s1 + $0x8] sm:$0xff]  ;;  %v186_v23 = vlaneseq }
   0x4   :  { %4748 = vset.pattern.permute.xlu0 %v4902_v5  ;;  %4516 = vmatprep.subr.msk.mxu0 %vm49_vm0, %v38_v1  ;;  %v18_v6 = vld [vmem:[%s6604_s2] sm:$0xff]  ;;  %s4903_s22 = smov 96   ;;  %s4904_s23 = smov 112   ;;  %v4984_v13 = vld [vmem:[%s6603_s1 + $0x10] sm:$0xff]  ;;  %v4910_v21 = vmov 1983009808  }
   0x5   :  { %28 = vperm.xlu0 %4748, %v19_v3   ;;  %4517 = vmatpush1.msk.msra.mxu0 %vm49_vm0, %v36_v0  ;;  %s4905_s24 = smov 64   ;;  %s4906_s25 = smov 80   ;;  %v184_v22 = vunpack.c.l.s4 %v4910_v21  ;;  %v187_v27 = vshrl.u32 %v186_v23, 7  ;;  %v4911_v29 = vmov 1934713408   ;;  %vm1085_vm2 = vcmask 130048  }
   0x6   :  { %4518 = vmatmul.mubr.msk.f32.vlgmr.msra.gmra.mxu0 %vm39_vm1, %v4944_v4  ;;  %s4907_s26 = smov 32   ;;  %s4908_s27 = smov 48   ;;  %v248_v30 = vunpack.c.l.s4 %v4911_v29  ;;  %vm2255_vm3 = vcmask 261120   ;;  %vm2257_vm4 = vcmask 392192   ;;  %vm2259_vm5 = vcmask 523264  }
   0x7   :  { %124 = vmatprep.mubr.f32.mxu0 %v4901_v2  ;;  %s4909_s30 = smov 16   ;;  %v185_v26 = vunpack.c.0.s8 %v184_v22  ;;  %vm2261_vm6 = vcmask 654336   ;;  %vm2263_vm7 = vcmask 785408   ;;  %vm2265_vm8 = vcmask 916480  }
   0x8   :  { %v249_v37 = vunpack.c.0.s8 %v248_v30 }
   0x9   :  { %23 = vperm.xlu0 %4748, %v18_v6   ;;  %v5041_v33 = vsub.s32 %v185_v26, %v187_v27 }
   0xa   :  { %4519 = vmatmul.mubr.msk.f32.gmra.mxu0 %vm39_vm1, %v4957_v7  ;;  %v5050_v45 = vsub.s32 %v249_v37, %v187_v27 }
   0xb   :  { %130 = vmatprep.mubr.f32.mxu0 %v4901_v2 }
   0xe   :  { %4520 = vmatmul.mubr.msk.f32.gmra.mxu0 %vm39_vm1, %v4984_v13 }
  0x80   :  { %v4962_v8 = vpop.permute.xlu0 %28 }
  0x84   :  { %v4964_v9 = vpop.permute.xlu0 %23 }
  0xc6   :  { %v120_v10 = vpop.f32.mrf.mxu0 }
  0xc7   :  { %v4967_v11 = vadd.f32 %v120_v10, %v4964_v9 }
  0xc8   :  { %v122_v12 = vpop.f32.mrf.mxu0 }
  0xc9   :  { %141 = vrot.lane.b32.xlu1 %v4967_v11, %s4903_s22  ;;  %138 = vrot.lane.b32.xlu0 %v4967_v11, %s4904_s23  ;;  %v4989_v14 = vadd.f32 %v122_v12, %v4964_v9 }
  0xca   :  { %v126_v15 = vpop.f32.mrf.mxu0 }
  0xcb   :  { %v5004_v16 = vadd.f32 %v126_v15, %v4962_v8 }
  0xcc   :  { %v128_v17 = vpop.f32.mrf.mxu0 }
  0xcd   :  { %147 = vrot.lane.b32.xlu1 %v4967_v11, %s4905_s24  ;;  %144 = vrot.lane.b32.xlu0 %v4967_v11, %s4906_s25  ;;  %v5019_v18 = vadd.f32 %v128_v17, %v4962_v8 }
  0xd1   :  { %153 = vrot.lane.b32.xlu1 %v4967_v11, %s4907_s26  ;;  %150 = vrot.lane.b32.xlu0 %v4967_v11, %s4908_s27 }
  0xd5   :  { %160 = vrot.lane.b32.xlu1 %v4989_v14, %s4904_s23  ;;  %156 = vrot.lane.b32.xlu0 %v4967_v11, %s4909_s30 }
  0xd9   :  { %166 = vrot.lane.b32.xlu1 %v4989_v14, %s4906_s25  ;;  %163 = vrot.lane.b32.xlu0 %v4989_v14, %s4903_s22 }
  0xdd   :  { %172 = vrot.lane.b32.xlu1 %v4989_v14, %s4908_s27  ;;  %169 = vrot.lane.b32.xlu0 %v4989_v14, %s4905_s24 }
  0xe1   :  { %454 = vrot.lane.b32.xlu1 %v5004_v16, %s4904_s23  ;;  %457 = vrot.lane.b32.xlu0 %v5004_v16, %s4903_s22 }
  0xe5   :  { %460 = vrot.lane.b32.xlu1 %v5004_v16, %s4906_s25  ;;  %463 = vrot.lane.b32.xlu0 %v5004_v16, %s4905_s24 }
  0xe9   :  { %466 = vrot.lane.b32.xlu1 %v5004_v16, %s4908_s27  ;;  %469 = vrot.lane.b32.xlu0 %v5004_v16, %s4907_s26 }
  0xed   :  { %472 = vrot.lane.b32.xlu1 %v5004_v16, %s4909_s30  ;;  %482 = vrot.lane.b32.xlu0 %v5019_v18, %s4906_s25 }
  0xf1   :  { %476 = vrot.lane.b32.xlu1 %v5019_v18, %s4904_s23  ;;  %488 = vrot.lane.b32.xlu0 %v5019_v18, %s4908_s27 }
  0xf5   :  { %479 = vrot.lane.b32.xlu1 %v5019_v18, %s4903_s22  ;;  %494 = vrot.lane.b32.xlu0 %v5019_v18, %s4909_s30 }
  0xf9   :  { %485 = vrot.lane.b32.xlu1 %v5019_v18, %s4905_s24  ;;  %175 = vrot.lane.b32.xlu0 %v4989_v14, %s4907_s26 }
  0xfd   :  { %491 = vrot.lane.b32.xlu1 %v5019_v18, %s4907_s26 }
 0x101   :  { %178 = vrot.lane.b32.xlu1 %v4989_v14, %s4909_s30 }
 0x13b   :  { %v142_v19 = vpop.permute.xlu1 %141  ;;  %v139_v20 = vpop.permute.xlu0 %138 }
 0x13c   :  { %v181_v34 = vcombine.low %v4967_v11, %v142_v19  ;;  %v182_v5 = vcombine.high %v4967_v11, %v142_v19 }
 0x13e   :  { %v189_v40 = vrot.slane %v181_v34, %v5041_v33 }
 0x13f   :  { %v148_v24 = vpop.permute.xlu1 %147  ;;  %v145_v25 = vpop.permute.xlu0 %144 }
 0x140   :  { %v197_v28 = vcombine.low %v139_v20, %v145_v25  ;;  %v198_v1 = vcombine.high %v139_v20, %v145_v25  ;;  %v5095_v20 = vrot.slane %v182_v5, %v5041_v33 }
 0x142   :  { %v205_v35 = vrot.slane %v197_v28, %v5041_v33  ;;  %v5089_v21 = vrot.slane %v198_v1, %v5041_v33 }
 0x143   :  { %v154_v31 = vpop.permute.xlu1 %153  ;;  %v151_v32 = vpop.permute.xlu0 %150 }
 0x144   :  { %v213_v36 = vcombine.low %v148_v24, %v154_v31  ;;  %v246_v42 = vcombine.high %v189_v40, %v205_v35  ;;  %v245_v49 = vcombine.low %v189_v40, %v205_v35  ;;  %v214_v12 = vcombine.high %v148_v24, %v154_v31 }
 0x145   :  { %v261_v26 = vcombine.low %v5095_v20, %v5089_v21  ;;  %v262_v40 = vcombine.high %v5095_v20, %v5089_v21 }
 0x146   :  { %v221_v43 = vrot.slane %v213_v36, %v5041_v33  ;;  %v5055_v51 = vrot.slane %v246_v42, %v5050_v45  ;;  %v5068_v56 = vrot.slane %v245_v49, %v5050_v45  ;;  %v5102_v19 = vrot.slane %v214_v12, %v5041_v33 }
 0x147   :  { %v5045_v38 = vpop.permute.xlu1 %160  ;;  %v157_v39 = vpop.permute.xlu0 %156  ;;  %v5124_v42 = vrot.slane %v261_v26, %v5050_v45 }
 0x148   :  { %v229_v41 = vcombine.low %v151_v32, %v157_v39  ;;  %v230_v3 = vcombine.high %v151_v32, %v157_v39 }
 0x14a   :  { %v237_v44 = vrot.slane %v229_v41, %v5041_v33  ;;  %v5092_v22 = vrot.slane %v230_v3, %v5041_v33 }
 0x14b   :  { %v167_v46 = vpop.permute.xlu1 %166  ;;  %v5052_v47 = vpop.permute.xlu0 %163 }
 0x14c   :  { %v278_v48 = vcombine.high %v221_v43, %v237_v44  ;;  %v277_v50 = vcombine.low %v221_v43, %v237_v44  ;;  %v333_v15 = vcombine.low %v5045_v38, %v167_v46  ;;  %v317_v17 = vcombine.low %v4989_v14, %v5052_v47 }
 0x14d   :  { %v293_v28 = vcombine.low %v5102_v19, %v5092_v22  ;;  %v334_v29 = vcombine.high %v5045_v38, %v167_v46  ;;  %v318_v35 = vcombine.high %v4989_v14, %v5052_v47  ;;  %v294_v43 = vcombine.high %v5102_v19, %v5092_v22 }
 0x14e   :  { %v5058_v52 = vrot.slane %v278_v48, %v5050_v45  ;;  %v5065_v55 = vrot.slane %v277_v50, %v5050_v45  ;;  %v341_v24 = vrot.slane %v333_v15, %v5041_v33  ;;  %v325_v25 = vrot.slane %v317_v17, %v5041_v33 }
 0x14f   :  { %v5060_v53 = vpop.permute.xlu1 %172  ;;  %v5062_v54 = vpop.permute.xlu0 %169  ;;  %v5133_v46 = vrot.slane %v334_v29, %v5041_v33 }
 0x150   :  { %v312_v57 = vcombine.high %v5055_v51, %v5058_v52  ;;  %v309_v58 = vcombine.low %v5068_v56, %v5065_v55  ;;  %v382_v36 = vcombine.high %v325_v25, %v341_v24  ;;  %v381_v14 = vcombine.low %v325_v25, %v341_v24 }
 0x151   :  { %v310_v21 = vcombine.high %v5068_v56, %v5065_v55 }
 0x152   :  { %4648 = vmatprep.mubr.msk.f32.mxu0 %vm1085_vm2, %v312_v57  ;;  %4627 = vmatprep.mubr.msk.f32.mxu1 %vm1085_vm2, %v309_v58  ;;  %v5141_v57 = vrot.slane %v318_v35, %v5041_v33  ;;  %v5144_v58 = vrot.slane %v382_v36, %v5050_v45  ;;  %v5160_v25 = vrot.slane %v381_v14, %v5050_v45 }
 0x153   :  { %v455_v59 = vpop.permute.xlu1 %454  ;;  %v458_v60 = vpop.permute.xlu0 %457 }
 0x154   :  { %v497_v30 = vcombine.low %v5004_v16, %v458_v60  ;;  %v498_v37 = vcombine.high %v5004_v16, %v458_v60  ;;  %v5130_v16 = vrot.slane %v293_v28, %v5050_v45 }
 0x156   :  { %v505_v47 = vrot.slane %v497_v30, %v5041_v33 }
 0x157   :  { %v461_v61 = vpop.permute.xlu1 %460  ;;  %v5076_v62 = vpop.permute.xlu0 %463 }
 0x158   :  { %v513_v27 = vcombine.low %v455_v59, %v461_v61  ;;  %v514_v31 = vcombine.high %v455_v59, %v461_v61  ;;  %v5147_v59 = vrot.slane %v498_v37, %v5041_v33 }
 0x15a   :  { %v5119_v41 = vrot.slane %v513_v27, %v5041_v33  ;;  %v5137_v48 = vrot.slane %v514_v31, %v5041_v33 }
 0x15b   :  { %v5078_v63 = vpop.permute.xlu1 %466  ;;  %v5080_v0 = vpop.permute.xlu0 %469 }
 0x15c   :  { %v529_v38 = vcombine.low %v5076_v62, %v5080_v0  ;;  %v562_v61 = vcombine.high %v505_v47, %v5119_v41  ;;  %v530_v1 = vcombine.high %v5076_v62, %v5080_v0  ;;  %v561_v12 = vcombine.low %v505_v47, %v5119_v41 }
 0x15d   :  { %v577_v26 = vcombine.low %v5147_v59, %v5137_v48  ;;  %v578_v56 = vcombine.high %v5147_v59, %v5137_v48 }
 0x15e   :  { %v537_v3 = vrot.slane %v529_v38, %v5041_v33  ;;  %v5170_v31 = vrot.slane %v530_v1, %v5041_v33  ;;  %v5177_v36 = vrot.slane %v562_v61, %v5050_v45 }
 0x15f   :  { %v473_v6 = vpop.permute.xlu1 %472  ;;  %v5083_v10 = vpop.permute.xlu0 %482  ;;  %v585_v22 = vrot.slane %v577_v26, %v5050_v45 }
 0x160   :  { %v545_v32 = vcombine.low %v5078_v63, %v473_v6  ;;  %v546_v5 = vcombine.high %v5078_v63, %v473_v6 }
 0x162   :  { %v553_v49 = vrot.slane %v545_v32, %v5041_v33  ;;  %v5173_v32 = vrot.slane %v546_v5, %v5041_v33 }
 0x163   :  { %v5097_v23 = vpop.permute.xlu1 %476  ;;  %v5099_v11 = vpop.permute.xlu0 %488 }
 0x164   :  { %v649_v60 = vcombine.low %v5097_v23, %v5083_v10  ;;  %v594_v27 = vcombine.high %v537_v3, %v553_v49  ;;  %v650_v62 = vcombine.high %v5097_v23, %v5083_v10  ;;  %v610_v20 = vcombine.high %v5170_v31, %v5173_v32 }
 0x166   :  { %v657_v6 = vrot.slane %v649_v60, %v5041_v33  ;;  %v5188_v38 = vrot.slane %v594_v27, %v5050_v45  ;;  %v5191_v14 = vrot.slane %v650_v62, %v5041_v33  ;;  %v624_v59 = vrot.slane %v610_v20, %v5050_v45 }
 0x167   :  { %v480_v34 = vpop.permute.xlu1 %479  ;;  %v495_v39 = vpop.permute.xlu0 %494 }
 0x168   :  { %v633_v44 = vcombine.low %v5019_v18, %v480_v34  ;;  %v681_v17 = vcombine.low %v5099_v11, %v495_v39  ;;  %v634_v0 = vcombine.high %v5019_v18, %v480_v34  ;;  %v682_v28 = vcombine.high %v5099_v11, %v495_v39 }
 0x169   :  { %v593_v34 = vcombine.low %v537_v3, %v553_v49 }
 0x16a   :  { %v641_v15 = vrot.slane %v633_v44, %v5041_v33  ;;  %v689_v18 = vrot.slane %v681_v17, %v5041_v33  ;;  %v5185_v37 = vrot.slane %v634_v0, %v5041_v33  ;;  %v696_v44 = vrot.slane %v682_v28, %v5041_v33 }
 0x16b   :  { %v486_v50 = vpop.permute.xlu1 %485  ;;  %v176_v24 = vpop.permute.xlu0 %175  ;;  %v609_v28 = vcombine.low %v5170_v31, %v5173_v32 }
 0x16c   :  { %v349_v35 = vcombine.low %v5062_v54, %v176_v24  ;;  %v698_v10 = vcombine.high %v641_v15, %v657_v6  ;;  %v697_v41 = vcombine.low %v641_v15, %v657_v6  ;;  %v350_v60 = vcombine.high %v5062_v54, %v176_v24 }
 0x16d   :  { %v713_v27 = vcombine.low %v5185_v37, %v5191_v14  ;;  %v601_v24 = vrot.slane %v593_v34, %v5050_v45 }
 0x16e   :  { %v357_v49 = vrot.slane %v349_v35, %v5041_v33  ;;  %v712_v15 = vrot.slane %v698_v10, %v5050_v45  ;;  %v705_v62 = vrot.slane %v697_v41, %v5050_v45  ;;  %v628_v35 = vcombine.high %v5177_v36, %v5188_v38 }
 0x16f   :  { %v492_v63 = vpop.permute.xlu1 %491  ;;  %v364_v10 = vrot.slane %v350_v60, %v5041_v33 }
 0x170   :  { %v665_v29 = vcombine.low %v486_v50, %v492_v63  ;;  %v666_v30 = vcombine.high %v486_v50, %v492_v63 }
 0x172   :  { %v673_v23 = vrot.slane %v665_v29, %v5041_v33  ;;  %v5182_v11 = vrot.slane %v666_v30, %v5041_v33  ;;  %v569_v30 = vrot.slane %v561_v12, %v5050_v45  ;;  %v5225_v12 = vrot.slane %v713_v27, %v5050_v45 }
 0x173   :  { %v179_v39 = vpop.permute.xlu1 %178  ;;  %v398_v27 = vcombine.high %v5141_v57, %v5133_v46 }
 0x174   :  { %v730_v47 = vcombine.high %v673_v23, %v689_v18  ;;  %v365_v50 = vcombine.low %v5060_v53, %v179_v39  ;;  %v366_v61 = vcombine.high %v5060_v53, %v179_v39  ;;  %v729_v1 = vcombine.low %v673_v23, %v689_v18 }
 0x175   :  { %v745_v3 = vcombine.low %v5182_v11, %v696_v44  ;;  %v746_v39 = vcombine.high %v5182_v11, %v696_v44  ;;  %v625_v41 = vcombine.low %v569_v30, %v601_v24  ;;  %v5238_v11 = vrot.slane %v262_v40, %v5050_v45 }
 0x176   :  { %v373_v5 = vrot.slane %v365_v50, %v5041_v33  ;;  %v744_v17 = vrot.slane %v730_v47, %v5050_v45  ;;  %v737_v54 = vrot.slane %v729_v1, %v5050_v45  ;;  %v5208_v53 = vrot.slane %v366_v61, %v5041_v33 }
 0x177   :  { %v5221_v34 = vrot.slane %v745_v3, %v5050_v45  ;;  %v5232_v61 = vrot.slane %v609_v28, %v5050_v45  ;;  %v5244_v44 = vrot.slane %v294_v43, %v5050_v45  ;;  %v397_v1 = vcombine.low %v5141_v57, %v5133_v46 }
 0x178   :  { %v413_v0 = vcombine.low %v357_v49, %v373_v5  ;;  %v414_v63 = vcombine.high %v357_v49, %v373_v5  ;;  %v764_v6 = vcombine.high %v712_v15, %v744_v17  ;;  %v761_v29 = vcombine.low %v705_v62, %v737_v54 }
 0x179   :  { %v429_v47 = vcombine.low %v364_v10, %v5208_v53  ;;  %v762_v49 = vcombine.high %v705_v62, %v737_v54  ;;  %v714_v3 = vcombine.high %v5185_v37, %v5191_v14  ;;  %v766_v5 = vcombine.high %v5225_v12, %v5221_v34 }
 0x17a   :  { %v5217_v18 = vrot.slane %v414_v63, %v5050_v45  ;;  %4644 = vmatprep.subr.mxu0 %v764_v6  ;;  %v421_v23 = vrot.slane %v413_v0, %v5050_v45  ;;  %4623 = vmatprep.subr.mxu1 %v761_v29  ;;  %v314_v40 = vcombine.high %v5124_v42, %v5130_v16 }
 0x17b   :  { %4645 = vmatpush3.msra.mxu0 %v764_v6  ;;  %4624 = vmatpush3.msra.mxu1 %v761_v29  ;;  %v437_v19 = vrot.slane %v429_v47, %v5050_v45  ;;  %v760_v55 = vrot.slane %v746_v39, %v5050_v45  ;;  %v626_v43 = vcombine.high %v569_v30, %v601_v24 }
 0x17c   :  { %v448_v50 = vcombine.high %v5144_v58, %v5217_v18  ;;  %4646 = vmatprep.subr.mxu0 %v628_v35  ;;  %v445_v60 = vcombine.low %v5160_v25, %v421_v23  ;;  %4625 = vmatprep.subr.mxu1 %v625_v41  ;;  %v630_v31 = vcombine.high %v585_v22, %v5232_v61 }
 0x17d   :  { %4626 = vmatpush3.msra.mxu1 %v625_v41  ;;  %4647 = vmatpush3.msra.mxu0 %v628_v35  ;;  %v405_v26 = vrot.slane %v397_v1, %v5050_v45  ;;  %v430_v32 = vcombine.high %v364_v10, %v5208_v53  ;;  %v728_v37 = vrot.slane %v714_v3, %v5050_v45 }
 0x17e   :  { %4628 = vmatmul.mubr.msk.f32.vlgmr.msra.gmra.mxu1 %vm1085_vm2, %v445_v60  ;;  %4630 = vmatprep.subr.mxu1 %v762_v49  ;;  %v446_v14 = vcombine.high %v5160_v25, %v421_v23  ;;  %v763_v48 = vcombine.low %v712_v15, %v744_v17  ;;  %v311_v24 = vcombine.low %v5055_v51, %v5058_v52 }
 0x17f   :  { %4649 = vmatmul.mubr.msk.f32.vlgmr.msra.gmra.mxu0 %vm1085_vm2, %v448_v50  ;;  %4658 = vmatprep.subr.mxu0 %v766_v5  ;;  %v450_v62 = vcombine.high %v405_v26, %v437_v19  ;;  %v768_v54 = vcombine.high %v728_v37, %v760_v55  ;;  %v592_v25 = vrot.slane %v578_v56, %v5050_v45 }
 0x180   :  { %4631 = vmatpush3.msra.mxu1 %v762_v49  ;;  %4634 = vmatprep.mubr.msk.f32.mxu1 %vm1085_vm2, %v310_v21  ;;  %v444_v53 = vrot.slane %v430_v32, %v5050_v45  ;;  %v316_v46 = vcombine.high %v5238_v11, %v5244_v44  ;;  %v627_v57 = vcombine.low %v5177_v36, %v5188_v38 }
 0x181   :  { %4659 = vmatpush3.msra.mxu0 %v766_v5  ;;  %4662 = vmatprep.mubr.msk.f32.mxu0 %vm1085_vm2, %v314_v40  ;;  %v632_v15 = vcombine.high %v592_v25, %v624_v59  ;;  %v412_v17 = vrot.slane %v398_v27, %v5050_v45  ;;  %v447_v51 = vcombine.low %v5144_v58, %v5217_v18  ;;  %v4537_v58 = vld [vmem:[%s6602_s0 + $0x8] sm:$0xff] }
 0x182   :  { %4632 = vmatprep.subr.mxu1 %v626_v43  ;;  %4660 = vmatprep.subr.mxu0 %v630_v31  ;;  %v765_v52 = vcombine.low %v5225_v12, %v5221_v34  ;;  %v313_v36 = vcombine.low %v5124_v42, %v5130_v16  ;;  %v629_v38 = vcombine.low %v585_v22, %v5232_v61 }
 0x183   :  { %4633 = vmatpush3.msra.mxu1 %v626_v43  ;;  %4661 = vmatpush3.msra.mxu0 %v630_v31  ;;  %v452_v0 = vcombine.high %v412_v17, %v444_v53  ;;  %v449_v63 = vcombine.low %v405_v26, %v437_v19  ;;  %v767_v6 = vcombine.low %v728_v37, %v760_v55 }
 0x184   :  { %4635 = vmatmul.mubr.msk.f32.vlgmr.msra.gmra.mxu1 %vm1085_vm2, %v446_v14  ;;  %4637 = vmatprep.subr.mxu1 %v763_v48  ;;  %v315_v28 = vcombine.low %v5238_v11, %v5244_v44  ;;  %v631_v42 = vcombine.low %v592_v25, %v624_v59  ;;  %v2279_v16 = vcombine.high %v4537_v58, %v4537_v58 }
 0x185   :  { %4663 = vmatmul.mubr.msk.f32.vlgmr.msra.gmra.mxu0 %vm1085_vm2, %v450_v62  ;;  %4672 = vmatprep.subr.mxu0 %v768_v54  ;;  %v451_v29 = vcombine.low %v412_v17, %v444_v53 }
 0x186   :  { %4638 = vmatpush3.msra.mxu1 %v763_v48  ;;  %4641 = vmatprep.mubr.msk.f32.mxu1 %vm1085_vm2, %v311_v24 }
 0x187   :  { %4673 = vmatpush3.msra.mxu0 %v768_v54  ;;  %4676 = vmatprep.mubr.msk.f32.mxu0 %vm1085_vm2, %v316_v46 }
 0x188   :  { %4639 = vmatprep.subr.mxu1 %v627_v57  ;;  %4674 = vmatprep.subr.mxu0 %v632_v15 }
 0x189   :  { %4640 = vmatpush3.msra.mxu1 %v627_v57  ;;  %4675 = vmatpush3.msra.mxu0 %v632_v15 }
 0x18a   :  { %4642 = vmatmul.mubr.msk.f32.vlgmr.msra.gmra.mxu1 %vm1085_vm2, %v447_v51  ;;  %4651 = vmatprep.subr.mxu1 %v765_v52 }
 0x18b   :  { %4677 = vmatmul.mubr.msk.f32.vlgmr.msra.gmra.mxu0 %vm1085_vm2, %v452_v0  ;;  %4652 = vmatpush3.msra.mxu1 %v765_v52 }
 0x18c   :  { %4655 = vmatprep.mubr.msk.f32.mxu1 %vm1085_vm2, %v313_v36  ;;  %4653 = vmatprep.subr.mxu1 %v629_v38 }
 0x18d   :  { %4654 = vmatpush3.msra.mxu1 %v629_v38 }
 0x18e   :  { %4656 = vmatmul.mubr.msk.f32.vlgmr.msra.gmra.mxu1 %vm1085_vm2, %v449_v63  ;;  %4665 = vmatprep.subr.mxu1 %v767_v6 }
 0x18f   :  { %4666 = vmatpush3.msra.mxu1 %v767_v6  ;;  %4669 = vmatprep.mubr.msk.f32.mxu1 %vm1085_vm2, %v315_v28 }
 0x190   :  { %4667 = vmatprep.subr.mxu1 %v631_v42 }
 0x191   :  { %4668 = vmatpush3.msra.mxu1 %v631_v42 }
 0x192   :  { %4670 = vmatmul.mubr.msk.f32.vlgmr.msra.gmra.mxu1 %vm1085_vm2, %v451_v29  ;;  %4538 = vmatprep.subr.msk.mxu1 %vm49_vm0, %v2279_v16 }
 0x193   :  { %4539 = vmatpush1.msk.msra.mxu1 %vm49_vm0, %v4537_v58  ;;  %2348 = vmatprep.mubr.f32.mxu1 %v4901_v2 }
 0x196   :  { %4540 = vmatmul.mubr.msk.f32.vlgmr.msra.gmra.mxu1 %vm39_vm1, %v4944_v4 }
 0x197   :  { %2354 = vmatprep.mubr.f32.mxu1 %v4901_v2 }
 0x19a   :  { %4541 = vmatmul.mubr.msk.f32.gmra.mxu1 %vm39_vm1, %v4957_v7 }
 0x19b   :  { %2360 = vmatprep.mubr.f32.mxu1 %v4901_v2 }
 0x19e   :  { %4542 = vmatmul.mubr.msk.f32.gmra.mxu1 %vm39_vm1, %v4984_v13 }
 0x23e   :  { %v5320_v30 = vpop.f32.mrf.mxu1 }
 0x240   :  { %v5322_v35 = vpop.f32.mrf.mxu1 }
 0x244   :  { %v5324_v10 = vpop.f32.mrf.mxu1 }
 0x246   :  { %v5326_v18 = vpop.f32.mrf.mxu1 }
 0x24a   :  { %v5328_v23 = vpop.f32.mrf.mxu1 }
 0x24c   :  { %v5330_v4 = vpop.f32.mrf.mxu1 }
 0x24e   :  { %v5332_v34 = vpop.f32.mrf.mxu1 }
 0x250   :  { %v5334_v7 = vpop.f32.mrf.mxu1 }
 0x252   :  { %v5336_v2 = vpop.f32.mrf.mxu1 }
 0x254   :  { %v5338_v39 = vpop.f32.mrf.mxu1 }
 0x256   :  { %v2350_v13 = vpop.f32.mrf.mxu1 }
 0x257   :  { %v5341_v41 = vadd.f32 %v2350_v13, %v4964_v9 }
 0x258   :  { %v2352_v12 = vpop.f32.mrf.mxu1 }
 0x259   :  { %2371 = vrot.lane.b32.xlu1 %v5341_v41, %s4903_s22  ;;  %2368 = vrot.lane.b32.xlu0 %v5341_v41, %s4904_s23  ;;  %v5356_v47 = vadd.f32 %v2352_v12, %v4964_v9 }
 0x25a   :  { %v2356_v50 = vpop.f32.mrf.mxu1 }
 0x25b   :  { %v5371_v9 = vadd.f32 %v2356_v50, %v4962_v8 }
 0x25c   :  { %v2358_v60 = vpop.f32.mrf.mxu1 }
 0x25d   :  { %2377 = vrot.lane.b32.xlu1 %v5341_v41, %s4905_s24  ;;  %2374 = vrot.lane.b32.xlu0 %v5341_v41, %s4906_s25  ;;  %v5386_v49 = vadd.f32 %v2358_v60, %v4962_v8  ;;  %v20_v8 = vld [vmem:[%s6604_s2 + $0x10] sm:$0xff]  ;;  %s4912_s2 = smov [#allocation2]  }
 0x25e   :  { %s4505_s6 = sshll.u32 %s4912_s2, 4  ;;  %s4506_s6 = int_to_ptr.vmem [resolvable:$true] %s4505_s6 }
 0x25f   :  { %s4879_s7 = scalar_lea.vmem %s4506_s6, 512  ;;  %p4884_p1 = scmp.lt.s32.totalorder %s4506_s6, %s4506_s6 }
 0x260   :  { %p4880_p0 = scmp.ne.s32.totalorder %s4506_s6, %s4879_s7  ;;  %p4885_p2 = scmp.lt.s32.totalorder %s4879_s7, %s4879_s7 }
 0x261   :  { %2383 = vrot.lane.b32.xlu1 %v5341_v41, %s4907_s26  ;;  %2380 = vrot.lane.b32.xlu0 %v5341_v41, %s4908_s27 }
 0x262   :  { %p4886_p3 = por %p4885_p2, %p4884_p1 }
 0x264   :  { %p4887_p4 = pnand %p4886_p3, %p4880_p0 }
 0x265   :  { %2390 = vrot.lane.b32.xlu1 %v5356_v47, %s4904_s23  ;;  %2386 = vrot.lane.b32.xlu0 %v5341_v41, %s4909_s30 }
 0x269   :  { %2396 = vrot.lane.b32.xlu1 %v5356_v47, %s4906_s25  ;;  %2393 = vrot.lane.b32.xlu0 %v5356_v47, %s4903_s22 }
 0x26d   :  { %2402 = vrot.lane.b32.xlu1 %v5356_v47, %s4908_s27  ;;  %2399 = vrot.lane.b32.xlu0 %v5356_v47, %s4905_s24 }
 0x271   :  { %2684 = vrot.lane.b32.xlu1 %v5371_v9, %s4904_s23  ;;  %2687 = vrot.lane.b32.xlu0 %v5371_v9, %s4903_s22 }
 0x275   :  { %2690 = vrot.lane.b32.xlu1 %v5371_v9, %s4906_s25  ;;  %2693 = vrot.lane.b32.xlu0 %v5371_v9, %s4905_s24 }
 0x279   :  { %2696 = vrot.lane.b32.xlu1 %v5371_v9, %s4908_s27  ;;  %2699 = vrot.lane.b32.xlu0 %v5371_v9, %s4907_s26 }
 0x27d   :  { %2702 = vrot.lane.b32.xlu1 %v5371_v9, %s4909_s30  ;;  %2706 = vrot.lane.b32.xlu0 %v5386_v49, %s4904_s23 }
 0x281   :  { %2709 = vrot.lane.b32.xlu1 %v5386_v49, %s4903_s22  ;;  %2712 = vrot.lane.b32.xlu0 %v5386_v49, %s4906_s25 }
 0x285   :  { %2715 = vrot.lane.b32.xlu1 %v5386_v49, %s4905_s24  ;;  %2718 = vrot.lane.b32.xlu0 %v5386_v49, %s4908_s27 }
 0x289   :  { %2721 = vrot.lane.b32.xlu1 %v5386_v49, %s4907_s26  ;;  %2724 = vrot.lane.b32.xlu0 %v5386_v49, %s4909_s30 }
 0x28d   :  { %2408 = vrot.lane.b32.xlu1 %v5356_v47, %s4909_s30  ;;  %2405 = vrot.lane.b32.xlu0 %v5356_v47, %s4907_s26 }
 0x291   :  { %33 = vperm.xlu0 %4748, %v20_v8  }
 0x2cb   :  { %v2372_v61 = vpop.permute.xlu1 %2371  ;;  %v2369_v11 = vpop.permute.xlu0 %2368 }
 0x2cc   :  { %v2411_v20 = vcombine.low %v5341_v41, %v2372_v61  ;;  %v2412_v38 = vcombine.high %v5341_v41, %v2372_v61 }
 0x2ce   :  { %v2419_v56 = vrot.slane %v2411_v20, %v5041_v33  ;;  %v2426_v16 = vrot.slane %v2412_v38, %v5041_v33 }
 0x2cf   :  { %v2378_v44 = vpop.permute.xlu1 %2377  ;;  %v2375_v1 = vpop.permute.xlu0 %2374 }
 0x2d0   :  { %v2427_v3 = vcombine.low %v2369_v11, %v2375_v1  ;;  %v2428_v36 = vcombine.high %v2369_v11, %v2375_v1 }
 0x2d2   :  { %v2435_v22 = vrot.slane %v2427_v3, %v5041_v33  ;;  %v2442_v42 = vrot.slane %v2428_v36, %v5041_v33 }
 0x2d3   :  { %v2384_v5 = vpop.permute.xlu1 %2383  ;;  %v2381_v21 = vpop.permute.xlu0 %2380 }
 0x2d4   :  { %v2443_v19 = vcombine.low %v2378_v44, %v2384_v5  ;;  %v2475_v31 = vcombine.low %v2419_v56, %v2435_v22  ;;  %v2476_v26 = vcombine.high %v2419_v56, %v2435_v22  ;;  %v2491_v8 = vcombine.low %v2426_v16, %v2442_v42 }
 0x2d5   :  { %v2444_v41 = vcombine.high %v2378_v44, %v2384_v5  ;;  %v2492_v11 = vcombine.high %v2426_v16, %v2442_v42 }
 0x2d6   :  { %v2451_v32 = vrot.slane %v2443_v19, %v5041_v33  ;;  %v5419_v62 = vrot.slane %v2475_v31, %v5050_v45  ;;  %v5425_v24 = vrot.slane %v2476_v26, %v5050_v45  ;;  %v5468_v31 = vrot.slane %v2491_v8, %v5050_v45 }
 0x2d7   :  { %v5413_v40 = vpop.permute.xlu1 %2390  ;;  %v2387_v55 = vpop.permute.xlu0 %2386 }
 0x2d8   :  { %v2459_v43 = vcombine.low %v2381_v21, %v2387_v55  ;;  %v2460_v29 = vcombine.high %v2381_v21, %v2387_v55 }
 0x2da   :  { %v2467_v37 = vrot.slane %v2459_v43, %v5041_v33  ;;  %v5454_v1 = vrot.slane %v2460_v29, %v5041_v33  ;;  %v5461_v43 = vrot.slane %v2444_v41, %v5041_v33 }
 0x2db   :  { %v2397_v14 = vpop.permute.xlu1 %2396  ;;  %v2394_v48 = vpop.permute.xlu0 %2393 }
 0x2dc   :  { %v2507_v59 = vcombine.low %v2451_v32, %v2467_v37  ;;  %v2508_v27 = vcombine.high %v2451_v32, %v2467_v37  ;;  %v2563_v6 = vcombine.low %v5413_v40, %v2397_v14  ;;  %v2547_v28 = vcombine.low %v5356_v47, %v2394_v48 }
 0x2dd   :  { %v2564_v19 = vcombine.high %v5413_v40, %v2397_v14  ;;  %v2548_v55 = vcombine.high %v5356_v47, %v2394_v48  ;;  %v5473_v40 = vrot.slane %v2492_v11, %v5050_v45  ;;  %v2523_v47 = vcombine.low %v5461_v43, %v5454_v1 }
 0x2de   :  { %v5422_v54 = vrot.slane %v2507_v59, %v5050_v45  ;;  %v5428_v25 = vrot.slane %v2508_v27, %v5050_v45  ;;  %v2571_v50 = vrot.slane %v2563_v6, %v5041_v33  ;;  %v2555_v60 = vrot.slane %v2547_v28, %v5041_v33 }
 0x2df   :  { %v5430_v53 = vpop.permute.xlu1 %2402  ;;  %v5432_v46 = vpop.permute.xlu0 %2399  ;;  %v5484_v36 = vrot.slane %v2564_v19, %v5041_v33  ;;  %v5487_v38 = vrot.slane %v2548_v55, %v5041_v33 }
 0x2e0   :  { %v2539_v57 = vcombine.low %v5419_v62, %v5422_v54  ;;  %v2542_v15 = vcombine.high %v5425_v24, %v5428_v25  ;;  %v2611_v56 = vcombine.low %v2555_v60, %v2571_v50  ;;  %v2612_v26 = vcombine.high %v2555_v60, %v2571_v50 }
 0x2e2   :  { %4683 = vmatprep.mubr.msk.f32.mxu0 %vm1085_vm2, %v2539_v57  ;;  %4704 = vmatprep.mubr.msk.f32.mxu1 %vm1085_vm2, %v2542_v15  ;;  %v2524_v15 = vcombine.high %v5461_v43, %v5454_v1  ;;  %v5490_v6 = vrot.slane %v2611_v56, %v5050_v45  ;;  %v5497_v16 = vrot.slane %v2612_v26, %v5050_v45 }
 0x2e3   :  { %v2685_v17 = vpop.permute.xlu1 %2684  ;;  %v5440_v51 = vpop.permute.xlu0 %2687 }
 0x2e4   :  { %v2727_v3 = vcombine.low %v5371_v9, %v5440_v51  ;;  %v2728_v29 = vcombine.high %v5371_v9, %v5440_v51 }
 0x2e6   :  { %v5478_v14 = vrot.slane %v2727_v3, %v5041_v33 }
 0x2e7   :  { %v2691_v52 = vpop.permute.xlu1 %2690  ;;  %v5442_v0 = vpop.permute.xlu0 %2693 }
 0x2e8   :  { %v2743_v61 = vcombine.low %v2685_v17, %v2691_v52  ;;  %v2744_v48 = vcombine.high %v2685_v17, %v2691_v52 }
 0x2ea   :  { %v5464_v44 = vrot.slane %v2743_v61, %v5041_v33  ;;  %v5504_v8 = vrot.slane %v2744_v48, %v5041_v33 }
 0x2eb   :  { %v2697_v58 = vpop.permute.xlu1 %2696  ;;  %v2700_v63 = vpop.permute.xlu0 %2699 }
 0x2ec   :  { %v2759_v5 = vcombine.low %v5442_v0, %v2700_v63  ;;  %v2791_v28 = vcombine.low %v5478_v14, %v5464_v44  ;;  %v2760_v17 = vcombine.high %v5442_v0, %v2700_v63  ;;  %v2792_v9 = vcombine.high %v5478_v14, %v5464_v44 }
 0x2ee   :  { %v2767_v52 = vrot.slane %v2759_v5, %v5041_v33  ;;  %v5511_v51 = vrot.slane %v2760_v17, %v5041_v33  ;;  %v5517_v55 = vrot.slane %v2791_v28, %v5050_v45 }
 0x2ef   :  { %v2703_v13 = vpop.permute.xlu1 %2702  ;;  %v5449_v12 = vpop.permute.xlu0 %2706 }
 0x2f0   :  { %v2775_v20 = vcombine.low %v2697_v58, %v2703_v13  ;;  %v2776_v42 = vcombine.high %v2697_v58, %v2703_v13 }
 0x2f2   :  { %v2783_v59 = vrot.slane %v2775_v20, %v5041_v33  ;;  %v5514_v19 = vrot.slane %v2776_v42, %v5041_v33 }
 0x2f3   :  { %v2710_v22 = vpop.permute.xlu1 %2709  ;;  %v2713_v21 = vpop.permute.xlu0 %2712 }
 0x2f4   :  { %v2863_v32 = vcombine.low %v5386_v49, %v2710_v22  ;;  %v2879_v37 = vcombine.low %v5449_v12, %v2713_v21  ;;  %v2823_v41 = vcombine.low %v2767_v52, %v2783_v59  ;;  %v2864_v61 = vcombine.high %v5386_v49, %v2710_v22 }
 0x2f5   :  { %v2880_v0 = vcombine.high %v5449_v12, %v2713_v21  ;;  %v2824_v56 = vcombine.high %v2767_v52, %v2783_v59 }
 0x2f6   :  { %v2871_v50 = vrot.slane %v2863_v32, %v5041_v33  ;;  %v2887_v60 = vrot.slane %v2879_v37, %v5041_v33  ;;  %v5528_v37 = vrot.slane %v2823_v41, %v5050_v45  ;;  %v5531_v14 = vrot.slane %v2864_v61, %v5041_v33 }
 0x2f7   :  { %v2716_v27 = vpop.permute.xlu1 %2715  ;;  %v2719_v57 = vpop.permute.xlu0 %2718  ;;  %v5534_v48 = vrot.slane %v2880_v0, %v5041_v33 }
 0x2f8   :  { %v2927_v49 = vcombine.low %v2871_v50, %v2887_v60  ;;  %v2928_v12 = vcombine.high %v2871_v50, %v2887_v60 }
 0x2fa   :  { %v2935_v42 = vrot.slane %v2927_v49, %v5050_v45  ;;  %v5543_v60 = vrot.slane %v2928_v12, %v5050_v45  ;;  %v5566_v12 = vrot.slane %v2792_v9, %v5050_v45 }
 0x2fb   :  { %v2722_v63 = vpop.permute.xlu1 %2721  ;;  %v2725_v58 = vpop.permute.xlu0 %2724 }
 0x2fc   :  { %v2895_v13 = vcombine.low %v2716_v27, %v2722_v63  ;;  %v2896_v11 = vcombine.high %v2716_v27, %v2722_v63  ;;  %v2911_v3 = vcombine.low %v2719_v57, %v2725_v58  ;;  %v2912_v20 = vcombine.high %v2719_v57, %v2725_v58 }
 0x2fd   :  { %v5553_v63 = vrot.slane %v2824_v56, %v5050_v45  ;;  %v2855_v56 = vcombine.low %v5517_v55, %v5528_v37 }
 0x2fe   :  { %v2903_v22 = vrot.slane %v2895_v13, %v5041_v33  ;;  %v2919_v21 = vrot.slane %v2911_v3, %v5041_v33  ;;  %v5522_v5 = vrot.slane %v2896_v11, %v5041_v33  ;;  %v5525_v44 = vrot.slane %v2912_v20, %v5041_v33 }
 0x2ff   :  { %v2409_v26 = vpop.permute.xlu1 %2408  ;;  %v2406_v32 = vpop.permute.xlu0 %2405  ;;  %v2943_v3 = vcombine.low %v5531_v14, %v5534_v48  ;;  %v2858_v9 = vcombine.high %v5566_v12, %v5553_v63 }
 0x300   :  { %v2959_v27 = vcombine.low %v2903_v22, %v2919_v21  ;;  %v2960_v57 = vcombine.high %v2903_v22, %v2919_v21  ;;  %v2595_v59 = vcombine.low %v5430_v53, %v2409_v26  ;;  %v2596_v28 = vcombine.high %v5430_v53, %v2409_v26 }
 0x301   :  { %v2579_v17 = vcombine.low %v5432_v46, %v2406_v32  ;;  %v2580_v52 = vcombine.high %v5432_v46, %v2406_v32  ;;  %v2975_v61 = vcombine.low %v5522_v5, %v5525_v44  ;;  %v5569_v22 = vrot.slane %v2728_v29, %v5041_v33 }
 0x302   :  { %v2967_v50 = vrot.slane %v2959_v27, %v5050_v45  ;;  %v5546_v41 = vrot.slane %v2960_v57, %v5050_v45  ;;  %v2603_v0 = vrot.slane %v2595_v59, %v5041_v33  ;;  %v5556_v46 = vrot.slane %v2596_v28, %v5041_v33 }
 0x303   :  { %v2587_v53 = vrot.slane %v2579_v17, %v5041_v33  ;;  %v5559_v58 = vrot.slane %v2580_v52, %v5041_v33  ;;  %v2839_v21 = vcombine.low %v5511_v51, %v5514_v19  ;;  %v5582_v29 = vrot.slane %v2975_v61, %v5050_v45 }
 0x304   :  { %v2991_v13 = vcombine.low %v2935_v42, %v2967_v50  ;;  %v2994_v11 = vcombine.high %v5543_v60, %v5546_v41  ;;  %v2807_v27 = vcombine.low %v5569_v22, %v5504_v8  ;;  %v5592_v59 = vrot.slane %v2523_v47, %v5050_v45 }
 0x305   :  { %v2643_v20 = vcombine.low %v2587_v53, %v2603_v0  ;;  %v2644_v49 = vcombine.high %v2587_v53, %v2603_v0  ;;  %v2659_v57 = vcombine.low %v5559_v58, %v5556_v46  ;;  %v2976_v28 = vcombine.high %v5522_v5, %v5525_v44 }
 0x306   :  { %4679 = vmatprep.subr.mxu0 %v2991_v13  ;;  %4700 = vmatprep.subr.mxu1 %v2994_v11  ;;  %v5600_v61 = vrot.slane %v2943_v3, %v5050_v45  ;;  %v2627_v0 = vcombine.low %v5487_v38, %v5484_v36  ;;  %v2992_v53 = vcombine.high %v2935_v42, %v2967_v50 }
 0x307   :  { %v2651_v26 = vrot.slane %v2643_v20, %v5050_v45  ;;  %v5577_v32 = vrot.slane %v2644_v49, %v5050_v45  ;;  %4680 = vmatpush3.msra.mxu0 %v2991_v13  ;;  %4701 = vmatpush3.msra.mxu1 %v2994_v11  ;;  %v5605_v47 = vrot.slane %v2839_v21, %v5050_v45 }
 0x308   :  { %4681 = vmatprep.subr.mxu0 %v2855_v56  ;;  %4702 = vmatprep.subr.mxu1 %v2858_v9  ;;  %v5611_v5 = vrot.slane %v2524_v15, %v5050_v45  ;;  %v2944_v44 = vcombine.high %v5531_v14, %v5534_v48  ;;  %v2996_v13 = vcombine.high %v5600_v61, %v5582_v29 }
 0x309   :  { %v2675_v17 = vcombine.low %v5490_v6, %v2651_v26  ;;  %v2678_v52 = vcombine.high %v5497_v16, %v5577_v32  ;;  %4682 = vmatpush3.msra.mxu0 %v2855_v56  ;;  %4703 = vmatpush3.msra.mxu1 %v2858_v9  ;;  %v2540_v42 = vcombine.high %v5419_v62, %v5422_v54 }
 0x30a   :  { %v5621_v50 = vrot.slane %v2659_v57, %v5050_v45  ;;  %4686 = vmatprep.subr.mxu0 %v2992_v53  ;;  %v2544_v1 = vcombine.high %v5468_v31, %v5592_v59  ;;  %v2815_v43 = vrot.slane %v2807_v27, %v5050_v45  ;;  %v2840_v15 = vcombine.high %v5511_v51, %v5514_v19 }
 0x30b   :  { %4684 = vmatmul.mubr.msk.f32.vlgmr.msra.gmra.mxu0 %vm1085_vm2, %v2675_v17  ;;  %4705 = vmatmul.mubr.msk.f32.vlgmr.msra.gmra.mxu1 %vm1085_vm2, %v2678_v52  ;;  %v2856_v14 = vcombine.high %v5517_v55, %v5528_v37  ;;  %v2990_v62 = vrot.slane %v2976_v28, %v5050_v45  ;;  %v2635_v54 = vrot.slane %v2627_v0, %v5050_v45  ;;  %v132_v37 = vpop.f32.mrf.mxu0  ;;  %v1734_v17 = vsel %vm1085_vm2, %v5322_v35, -inf }
 0x30c   :  { %4714 = vmatprep.subr.mxu1 %v2996_v13  ;;  %4687 = vmatpush3.msra.mxu0 %v2992_v53  ;;  %v2808_v48 = vcombine.high %v5569_v22, %v5504_v8  ;;  %v2860_v11 = vcombine.high %v2815_v43, %v5605_v47  ;;  %v5637_v3 = vpop.permute.xlu0 %33  ;;  %v2660_v51 = vcombine.high %v5559_v58, %v5556_v46  ;;  %v1746_v52 = vsel %vm1085_vm2, %v5330_v4, -inf }
 0x30d   :  { %4690 = vmatprep.mubr.msk.f32.mxu0 %vm1085_vm2, %v2540_v42  ;;  %4715 = vmatpush3.msra.mxu1 %v2996_v13  ;;  %v2676_v19 = vcombine.high %v5490_v6, %v2651_v26  ;;  %v2958_v55 = vrot.slane %v2944_v44, %v5050_v45  ;;  %v2628_v8 = vcombine.high %v5487_v38, %v5484_v36  ;;  %v1743_v0 = vsel %vm1085_vm2, %v5324_v10, -inf }
 0x30e   :  { %4718 = vmatprep.mubr.msk.f32.mxu1 %vm1085_vm2, %v2544_v1  ;;  %4688 = vmatprep.subr.mxu0 %v2856_v14  ;;  %v2680_v20 = vcombine.high %v2635_v54, %v5621_v50  ;;  %v2993_v49 = vcombine.low %v5543_v60, %v5546_v41  ;;  %v5650_v46 = vadd.f32 %v132_v37, %v5637_v3  ;;  %v1758_v44 = vsel %vm1085_vm2, %v5334_v7, -inf }
 0x30f   :  { %4716 = vmatprep.subr.mxu1 %v2860_v11  ;;  %4689 = vmatpush3.msra.mxu0 %v2856_v14  ;;  %v2998_v6 = vcombine.high %v2958_v55, %v2990_v62  ;;  %v2854_v58 = vrot.slane %v2840_v15, %v5050_v45  ;;  %v2541_v36 = vcombine.low %v5425_v24, %v5428_v25  ;;  %v1770_v15 = vsel %vm1085_vm2, %v5338_v39, -inf }
 0x310   :  { %4717 = vmatpush3.msra.mxu1 %v2860_v11  ;;  %4691 = vmatmul.mubr.msk.f32.vlgmr.msra.gmra.mxu0 %vm1085_vm2, %v2676_v19  ;;  %v2674_v38 = vrot.slane %v2660_v51, %v5050_v45  ;;  %v2546_v60 = vcombine.high %v5473_v40, %v5611_v5  ;;  %v2822_v41 = vrot.slane %v2808_v48, %v5050_v45  ;;  %v1773_v48 = vsel %vm1085_vm2, %v5336_v2, -inf  ;;  %v2362_v51 = vpop.f32.mrf.mxu1 }
 0x311   :  { %4693 = vmatprep.subr.mxu0 %v2993_v49  ;;  %4719 = vmatmul.mubr.msk.f32.vlgmr.msra.gmra.mxu1 %vm1085_vm2, %v2680_v20  ;;  %v2857_v22 = vcombine.low %v5566_v12, %v5553_v63  ;;  %v2642_v21 = vrot.slane %v2628_v8, %v5050_v45  ;;  %v2677_v25 = vcombine.low %v5497_v16, %v5577_v32 }
 0x312   :  { %4728 = vmatprep.subr.mxu1 %v2998_v6  ;;  %4694 = vmatpush3.msra.mxu0 %v2993_v49  ;;  %v2862_v24 = vcombine.high %v2822_v41, %v2854_v58  ;;  %v2995_v63 = vcombine.low %v5600_v61, %v5582_v29  ;;  %v2543_v12 = vcombine.low %v5468_v31, %v5592_v59  ;;  %v134_v29 = vpop.f32.mrf.mxu0  ;;  %v1740_v59 = vsel %vm1085_vm2, %v5326_v18, -inf }
 0x313   :  { %4697 = vmatprep.mubr.msk.f32.mxu0 %vm1085_vm2, %v2541_v36  ;;  %4729 = vmatpush3.msra.mxu1 %v2998_v6  ;;  %v2682_v56 = vcombine.high %v2642_v21, %v2674_v38  ;;  %v2859_v16 = vcombine.low %v2815_v43, %v5605_v47  ;;  %v2679_v26 = vcombine.low %v2635_v54, %v5621_v50  ;;  %v1761_v43 = vsel %vm1085_vm2, %v5332_v34, -inf }
 0x314   :  { %4732 = vmatprep.mubr.msk.f32.mxu1 %vm1085_vm2, %v2546_v60  ;;  %773 = vrot.lane.b32.xlu0 %v5650_v46, %s4903_s22  ;;  %v2997_v32 = vcombine.low %v2958_v55, %v2990_v62  ;;  %v2545_v31 = vcombine.low %v5473_v40, %v5611_v5  ;;  %v2861_v9 = vcombine.low %v2822_v41, %v2854_v58  ;;  %v1737_v40 = vsel %vm1085_vm2, %v5320_v30, -inf  ;;  %v5717_v28 = vpop.f32.mrf.mxu0  ;;  %v2364_v55 = vpop.f32.mrf.mxu1 }
 0x315   :  { %770 = vrot.lane.b32.xlu1 %v5650_v46, %s4904_s23  ;;  %4695 = vmatprep.subr.mxu0 %v2857_v22  ;;  %v2681_v27 = vcombine.low %v2642_v21, %v2674_v38  ;;  %v5694_v57 = vadd.f32 %v134_v29, %v5637_v3  ;;  %v1749_v5 = vsel %vm1085_vm2, %v5328_v23, -inf  ;;  %v1755_v42 = vsel %vm1085_vm2, %v5717_v28, -inf }
 0x316   :  { %4730 = vmatprep.subr.mxu1 %v2862_v24  ;;  %4696 = vmatpush3.msra.mxu0 %v2857_v22  ;;  %v5723_v61 = vpop.f32.mrf.mxu0  ;;  %v5758_v19 = vadd.f32 %v2362_v51, %v5637_v3  ;;  %v5773_v37 = vadd.f32 %v2364_v55, %v5637_v3 }
 0x317   :  { %4731 = vmatpush3.msra.mxu1 %v2862_v24  ;;  %4698 = vmatmul.mubr.msk.f32.vlgmr.msra.gmra.mxu0 %vm1085_vm2, %v2677_v25  ;;  %v1752_v53 = vsel %vm1085_vm2, %v5723_v61, -inf }
 0x318   :  { %4707 = vmatprep.subr.mxu0 %v2995_v63  ;;  %4733 = vmatmul.mubr.msk.f32.vlgmr.msra.gmra.mxu1 %vm1085_vm2, %v2682_v56  ;;  %v5729_v47 = vpop.f32.mrf.mxu0  ;;  %6638 = vst [vmem:[#allocation5_spill] sm:$0xff] %v5773_v37 }
 0x319   :  { %4708 = vmatpush3.msra.mxu0 %v2995_v63  ;;  %4711 = vmatprep.mubr.msk.f32.mxu0 %vm1085_vm2, %v2543_v12  ;;  %v1767_v62 = vsel %vm1085_vm2, %v5729_v47, -inf }
 0x31a   :  { %779 = vrot.lane.b32.xlu0 %v5650_v46, %s4905_s24  ;;  %776 = vrot.lane.b32.xlu1 %v5650_v46, %s4906_s25  ;;  %v5735_v13 = vpop.f32.mrf.mxu0 }
 0x31b   :  { %4709 = vmatprep.subr.mxu0 %v2859_v16  ;;  %v1764_v50 = vsel %vm1085_vm2, %v5735_v13, -inf }
 0x31c   :  { %4710 = vmatpush3.msra.mxu0 %v2859_v16  ;;  %v5741_v1 = vpop.f32.mrf.mxu0 }
 0x31d   :  { %4712 = vmatmul.mubr.msk.f32.vlgmr.msra.gmra.mxu0 %vm1085_vm2, %v2679_v26  ;;  %4721 = vmatprep.subr.mxu0 %v2997_v32  ;;  %v1779_v11 = vsel %vm1085_vm2, %v5741_v1, -inf }
 0x31e   :  { %4722 = vmatpush3.msra.mxu0 %v2997_v32  ;;  %4725 = vmatprep.mubr.msk.f32.mxu0 %vm1085_vm2, %v2545_v31  ;;  %v5747_v14 = vpop.f32.mrf.mxu0 }
 0x31f   :  { %785 = vrot.lane.b32.xlu0 %v5650_v46, %s4907_s26  ;;  %782 = vrot.lane.b32.xlu1 %v5650_v46, %s4908_s27  ;;  %v1776_v54 = vsel %vm1085_vm2, %v5747_v14, -inf }
 0x320   :  { %4723 = vmatprep.subr.mxu0 %v2861_v9 }
 0x321   :  { %4724 = vmatpush3.msra.mxu0 %v2861_v9 }
 0x322   :  { %4726 = vmatmul.mubr.msk.f32.vlgmr.msra.gmra.mxu0 %vm1085_vm2, %v2681_v27 }
 0x323   :  { %792 = vrot.lane.b32.xlu0 %v5694_v57, %s4904_s23  ;;  %788 = vrot.lane.b32.xlu1 %v5650_v46, %s4909_s30 }
 0x327   :  { %798 = vrot.lane.b32.xlu0 %v5694_v57, %s4906_s25  ;;  %795 = vrot.lane.b32.xlu1 %v5694_v57, %s4903_s22 }
 0x32b   :  { %804 = vrot.lane.b32.xlu0 %v5694_v57, %s4908_s27  ;;  %801 = vrot.lane.b32.xlu1 %v5694_v57, %s4905_s24 }
 0x32f   :  { %810 = vrot.lane.b32.xlu0 %v5694_v57, %s4909_s30  ;;  %807 = vrot.lane.b32.xlu1 %v5694_v57, %s4907_s26 }
 0x34e   :  { %1738 = vmax.xlane.f32.xlu0 %v1737_v40 }
 0x352   :  { %1741 = vmax.xlane.f32.xlu0 %v1740_v59 }
 0x353   :  { %1735 = vmax.xlane.f32.xlu1 %v1734_v17 }
 0x356   :  { %1747 = vmax.xlane.f32.xlu0 %v1746_v52 }
 0x357   :  { %1744 = vmax.xlane.f32.xlu1 %v1743_v0 }
 0x35a   :  { %1753 = vmax.xlane.f32.xlu0 %v1752_v53 }
 0x35b   :  { %1750 = vmax.xlane.f32.xlu1 %v1749_v5 }
 0x35e   :  { %1759 = vmax.xlane.f32.xlu0 %v1758_v44 }
 0x35f   :  { %1756 = vmax.xlane.f32.xlu1 %v1755_v42 }
 0x362   :  { %1765 = vmax.xlane.f32.xlu0 %v1764_v50 }
 0x363   :  { %1762 = vmax.xlane.f32.xlu1 %v1761_v43 }
 0x366   :  { %1771 = vmax.xlane.f32.xlu0 %v1770_v15 }
 0x367   :  { %1768 = vmax.xlane.f32.xlu1 %v1767_v62 }
 0x36a   :  { %1777 = vmax.xlane.f32.xlu0 %v1776_v54 }
 0x36b   :  { %1774 = vmax.xlane.f32.xlu1 %v1773_v48 }
 0x36f   :  { %1780 = vmax.xlane.f32.xlu1 %v1779_v11 }
 0x380   :  { %3003 = vrot.lane.b32.xlu1 %v5758_v19, %s4903_s22  ;;  %3000 = vrot.lane.b32.xlu0 %v5758_v19, %s4904_s23 }
 0x384   :  { %3006 = vrot.lane.b32.xlu1 %v5758_v19, %s4906_s25  ;;  %3009 = vrot.lane.b32.xlu0 %v5758_v19, %s4905_s24 }
 0x386   :  { %v5783_v8 = vpop.permute.xlu0 %773 }
 0x387   :  { %v5785_v20 = vpop.permute.xlu1 %770 }
 0x388   :  { %3012 = vrot.lane.b32.xlu1 %v5758_v19, %s4908_s27  ;;  %3015 = vrot.lane.b32.xlu0 %v5758_v19, %s4907_s26 }
 0x38c   :  { %3018 = vrot.lane.b32.xlu1 %v5758_v19, %s4909_s30  ;;  %3022 = vrot.lane.b32.xlu0 %v5773_v37, %s4904_s23  ;;  %v5787_v49 = vpop.permute.xlu0 %779  ;;  %v5789_v3 = vpop.permute.xlu1 %776 }
 0x390   :  { %3025 = vrot.lane.b32.xlu1 %v5773_v37, %s4903_s22  ;;  %3028 = vrot.lane.b32.xlu0 %v5773_v37, %s4906_s25 }
 0x391   :  { %v5791_v6 = vpop.permute.xlu0 %785  ;;  %v5793_v58 = vpop.permute.xlu1 %782 }
 0x395   :  { %v5795_v36 = vpop.permute.xlu0 %792  ;;  %v5797_v38 = vpop.permute.xlu1 %788 }
 0x399   :  { %v5799_v60 = vpop.permute.xlu0 %798  ;;  %v5801_v41 = vpop.permute.xlu1 %795 }
 0x39d   :  { %v5803_v22 = vpop.permute.xlu0 %804  ;;  %v5805_v21 = vpop.permute.xlu1 %801 }
 0x3a1   :  { %v5807_v24 = vpop.permute.xlu0 %810  ;;  %v5809_v56 = vpop.permute.xlu1 %807 }
 0x3d7   :  { %v1739_v25 = vpop.xlane.xlu0 %1738 }
 0x3d8   :  { %v1783_v63 = vsub.f32 %v5320_v30, %v1739_v25 }
 0x3da   :  { %v1800_v12 = vmul.f32 1.442695, %v1783_v63 }
 0x3db   :  { %v1742_v16 = vpop.xlane.xlu0 %1741 }
 0x3dc   :  { %4751 = vpow2.f32 %v1800_v12  ;;  %v1736_v26 = vpop.xlane.xlu1 %1735  ;;  %v1784_v27 = vsub.f32 %v5326_v18, %v1742_v16 }
 0x3dd   :  { %v1782_v32 = vsub.f32 %v5322_v35, %v1736_v26 }
 0x3de   :  { %v1802_v52 = vmul.f32 1.442695, %v1784_v27 }
 0x3df   :  { %v1798_v31 = vmul.f32 1.442695, %v1782_v32  ;;  %v1748_v9 = vpop.xlane.xlu0 %1747 }
 0x3e0   :  { %v1745_v29 = vpop.xlane.xlu1 %1744  ;;  %v1786_v42 = vsub.f32 %v5330_v4, %v1748_v9 }
 0x3e1   :  { %4753 = vpow2.f32 %v1798_v31  ;;  %v1785_v30 = vsub.f32 %v5324_v10, %v1745_v29 }
 0x3e2   :  { %v1806_v54 = vmul.f32 1.442695, %v1786_v42 }
 0x3e3   :  { %v1754_v40 = vpop.xlane.xlu0 %1753  ;;  %v1804_v50 = vmul.f32 1.442695, %v1785_v30 }
 0x3e4   :  { %v1788_v59 = vsub.f32 %v5723_v61, %v1754_v40  ;;  %v1751_v17 = vpop.xlane.xlu1 %1750 }
 0x3e6   :  { %v1810_v0 = vmul.f32 1.442695, %v1788_v59 }
 0x3e7   :  { %v1760_v53 = vpop.xlane.xlu0 %1759 }
 0x3e8   :  { %4755 = vpow2.f32 %v1810_v0  ;;  %v1757_v5 = vpop.xlane.xlu1 %1756 }
 0x3e9   :  { %v5816_v44 = vpop.eup %4751  ;;  %v1789_v35 = vsub.f32 %v5717_v28, %v1757_v5  ;;  %4757 = vpow2.f32 %v1802_v52  ;;  %v1787_v28 = vsub.f32 %v5328_v23, %v1751_v17 }
 0x3ea   :  { %v1833_v18 = vsel %vm1085_vm2, %v5816_v44, 0.0 }
 0x3eb   :  { %v1812_v61 = vmul.f32 1.442695, %v1789_v35  ;;  %v1766_v43 = vpop.xlane.xlu0 %1765  ;;  %1834 = vadd.xlane.f32.xlu1 %v1833_v18  ;;  %v1808_v25 = vmul.f32 1.442695, %v1787_v28 }
 0x3ec   :  { %v1792_v15 = vsub.f32 %v5735_v13, %v1766_v43  ;;  %v1763_v10 = vpop.xlane.xlu1 %1762  ;;  %v1790_v13 = vsub.f32 %v5334_v7, %v1760_v53 }
 0x3ed   :  { %4759 = vpow2.f32 %v1812_v61  ;;  %v1791_v16 = vsub.f32 %v5332_v34, %v1763_v10 }
 0x3ee   :  { %v5823_v62 = vpop.eup %4753  ;;  %v1818_v48 = vmul.f32 1.442695, %v1792_v15  ;;  %4761 = vpow2.f32 %v1804_v50  ;;  %v1814_v31 = vmul.f32 1.442695, %v1790_v13 }
 0x3ef   :  { %v1772_v11 = vpop.xlane.xlu0 %1771  ;;  %v1830_v4 = vsel %vm1085_vm2, %v5823_v62, 0.0  ;;  %v1816_v40 = vmul.f32 1.442695, %v1791_v16 }
 0x3f0   :  { %4763 = vpow2.f32 %v1818_v48  ;;  %v1769_v51 = vpop.xlane.xlu1 %1768  ;;  %1831 = vadd.xlane.f32.xlu0 %v1830_v4  ;;  %v1794_v9 = vsub.f32 %v5338_v39, %v1772_v11 }
 0x3f1   :  { %v1793_v55 = vsub.f32 %v5729_v47, %v1769_v51  ;;  %4765 = vpow2.f32 %v1806_v54 }
 0x3f2   :  { %v1822_v17 = vmul.f32 1.442695, %v1794_v9 }
 0x3f3   :  { %v1820_v63 = vmul.f32 1.442695, %v1793_v55  ;;  %v1778_v12 = vpop.xlane.xlu0 %1777 }
 0x3f4   :  { %v1796_v26 = vsub.f32 %v5747_v14, %v1778_v12  ;;  %v1775_v23 = vpop.xlane.xlu1 %1774 }
 0x3f5   :  { %v5832_v32 = vpop.eup %4755  ;;  %4767 = vpow2.f32 %v1820_v63  ;;  %v1795_v39 = vsub.f32 %v5336_v2, %v1775_v23 }
 0x3f6   :  { %v1826_v29 = vmul.f32 1.442695, %v1796_v26  ;;  %v1848_v47 = vsel %vm1085_vm2, %v5832_v32, 0.0  ;;  %v5837_v27 = vpop.eup %4757  ;;  %4769 = vpow2.f32 %v1808_v25 }
 0x3f7   :  { %1849 = vadd.xlane.f32.xlu0 %v1848_v47  ;;  %v3001_v7 = vpop.permute.xlu0 %3000  ;;  %v1836_v52 = vsel %vm1085_vm2, %v5837_v27, 0.0  ;;  %v1824_v42 = vmul.f32 1.442695, %v1795_v39 }
 0x3f8   :  { %4771 = vpow2.f32 %v1826_v29  ;;  %v1781_v34 = vpop.xlane.xlu1 %1780 }
 0x3f9   :  { %v1797_v14 = vsub.f32 %v5741_v1, %v1781_v34  ;;  %4773 = vpow2.f32 %v1814_v31 }
 0x3fa   :  { %v5840_v59 = vpop.eup %4759  ;;  %4775 = vpow2.f32 %v1816_v40  ;;  %v5877_v40 = vpop.f32.mrf.mxu0 }
 0x3fb   :  { %v1828_v0 = vmul.f32 1.442695, %v1797_v14  ;;  %1837 = vadd.xlane.f32.xlu0 %v1836_v52  ;;  %v3010_v30 = vpop.permute.xlu0 %3009  ;;  %v1851_v53 = vsel %vm1085_vm2, %v5840_v59, 0.0  ;;  %v5847_v5 = vpop.eup %4761 }
 0x3fc   :  { %1852 = vadd.xlane.f32.xlu1 %v1851_v53  ;;  %v3004_v1 = vpop.permute.xlu1 %3003  ;;  %v1839_v15 = vsel %vm1085_vm2, %v5847_v5, 0.0 }
 0x3fd   :  { %v5849_v35 = vpop.eup %4763  ;;  %4777 = vpow2.f32 %v1828_v0  ;;  %v3043_v2 = vcombine.low %v5758_v19, %v3004_v1  ;;  %v3044_v61 = vcombine.high %v5758_v19, %v3004_v1 }
 0x3fe   :  { %4779 = vpow2.f32 %v1822_v17  ;;  %v1860_v18 = vsel %vm1085_vm2, %v5849_v35, 0.0  ;;  %v5854_v50 = vpop.eup %4765 }
 0x3ff   :  { %1861 = vadd.xlane.f32.xlu0 %v1860_v18  ;;  %v3016_v43 = vpop.permute.xlu0 %3015  ;;  %4781 = vpow2.f32 %v1824_v42  ;;  %v3051_v51 = vrot.slane %v3043_v2, %v5041_v33  ;;  %v1842_v55 = vsel %vm1085_vm2, %v5854_v50, 0.0  ;;  %v3058_v19 = vrot.slane %v3044_v61, %v5041_v33  ;;  %v5890_v42 = vpop.f32.mrf.mxu0 }
 0x400   :  { %v3075_v10 = vcombine.low %v3010_v30, %v3016_v43  ;;  %v3076_v54 = vcombine.high %v3010_v30, %v3016_v43  ;;  %1840 = vadd.xlane.f32.xlu1 %v1839_v15  ;;  %v3007_v48 = vpop.permute.xlu1 %3006 }
 0x401   :  { %v3059_v28 = vcombine.low %v3001_v7, %v3007_v48  ;;  %v3060_v11 = vcombine.high %v3001_v7, %v3007_v48 }
 0x402   :  { %v5859_v4 = vpop.eup %4767  ;;  %v3083_v30 = vrot.slane %v3075_v10, %v5041_v33  ;;  %v3090_v2 = vrot.slane %v3076_v54, %v5041_v33 }
 0x403   :  { %v3067_v13 = vrot.slane %v3059_v28, %v5041_v33  ;;  %v3074_v25 = vrot.slane %v3060_v11, %v5041_v33  ;;  %1843 = vadd.xlane.f32.xlu0 %v1842_v55  ;;  %v1863_v63 = vsel %vm1085_vm2, %v5859_v4, 0.0  ;;  %v5869_v12 = vpop.eup %4769 }
 0x404   :  { %1864 = vadd.xlane.f32.xlu1 %v1863_v63  ;;  %v3013_v16 = vpop.permute.xlu1 %3012  ;;  %v1845_v34 = vsel %vm1085_vm2, %v5869_v12, 0.0 }
 0x405   :  { %v5871_v26 = vpop.eup %4771  ;;  %v3107_v23 = vcombine.low %v3051_v51, %v3067_v13  ;;  %v3108_v31 = vcombine.high %v3051_v51, %v3067_v13  ;;  %v3123_v9 = vcombine.low %v3058_v19, %v3074_v25  ;;  %v3124_v29 = vcombine.high %v3058_v19, %v3074_v25  ;;  %v5909_v13 = vpop.f32.mrf.mxu1 }
 0x406   :  { %v1872_v47 = vsel %vm1085_vm2, %v5871_v26, 0.0  ;;  %v5875_v7 = vpop.eup %4773  ;;  %v5911_v25 = vpop.f32.mrf.mxu0 }
 0x407   :  { %1873 = vadd.xlane.f32.xlu0 %v1872_v47  ;;  %v5881_v17 = vpop.eup %4775  ;;  %v1854_v53 = vsel %vm1085_vm2, %v5875_v7, 0.0  ;;  %v5898_v11 = vrot.slane %v3107_v23, %v5050_v45  ;;  %v5901_v51 = vrot.slane %v3108_v31, %v5050_v45  ;;  %6641 = vst [vmem:[#allocation8_spill] sm:$0xff] %v5911_v25  ;;  %v5926_v47 = vrot.slane %v3123_v9, %v5050_v45 }
 0x408   :  { %1846 = vadd.xlane.f32.xlu1 %v1845_v34  ;;  %v3019_v14 = vpop.permute.xlu1 %3018  ;;  %v1857_v55 = vsel %vm1085_vm2, %v5881_v17, 0.0  ;;  %v5929_v34 = vrot.slane %v3124_v29, %v5050_v45 }
 0x409   :  { %v3091_v39 = vcombine.low %v3013_v16, %v3019_v14  ;;  %v3092_v52 = vcombine.high %v3013_v16, %v3019_v14  ;;  %6639 = vst [vmem:[#allocation6_spill] sm:$0xff] %v5898_v11  ;;  %6640 = vst [vmem:[#allocation7_spill] sm:$0xff] %v5901_v51  ;;  %v3963_v14 = vsel %vm1085_vm2, %v5890_v42, -inf }
 0x40a   :  { %v5883_v0 = vpop.eup %4777  ;;  %6646 = vst [vmem:[#allocation13_spill] sm:$0xff] %v5926_v47  ;;  %6647 = vst [vmem:[#allocation14_spill] sm:$0xff] %v5929_v34 }
 0x40b   :  { %v5888_v1 = vpop.eup %4779  ;;  %v3099_v18 = vrot.slane %v3091_v39, %v5041_v33  ;;  %v3106_v61 = vrot.slane %v3092_v52, %v5041_v33  ;;  %1855 = vadd.xlane.f32.xlu0 %v1854_v53  ;;  %v1875_v43 = vsel %vm1085_vm2, %v5883_v0, 0.0 }
 0x40c   :  { %1876 = vadd.xlane.f32.xlu1 %v1875_v43  ;;  %v1866_v54 = vsel %vm1085_vm2, %v5888_v1, 0.0  ;;  %v5907_v19 = vpop.eup %4781  ;;  %v5951_v43 = vpop.f32.mrf.mxu0 }
 0x40d   :  { %v3139_v15 = vcombine.low %v3083_v30, %v3099_v18  ;;  %v3140_v10 = vcombine.high %v3083_v30, %v3099_v18  ;;  %v3155_v48 = vcombine.low %v3090_v2, %v3106_v61  ;;  %v3156_v28 = vcombine.high %v3090_v2, %v3106_v61  ;;  %v5949_v61 = vpop.f32.mrf.mxu1 }
 0x40f   :  { %v5914_v63 = vrot.slane %v3139_v15, %v5050_v45  ;;  %v5917_v16 = vrot.slane %v3140_v10, %v5050_v45  ;;  %v5920_v23 = vrot.slane %v3155_v48, %v5050_v45  ;;  %v5923_v31 = vrot.slane %v3156_v28, %v5050_v45  ;;  %1867 = vadd.xlane.f32.xlu0 %v1866_v54  ;;  %v5957_v48 = vpop.f32.mrf.mxu1  ;;  %v5959_v28 = vpop.f32.mrf.mxu0 }
 0x410   :  { %1858 = vadd.xlane.f32.xlu1 %v1857_v55  ;;  %v1869_v15 = vsel %vm1085_vm2, %v5907_v19, 0.0  ;;  %v3981_v10 = vsel %vm1085_vm2, %v5949_v61, -inf  ;;  %6648 = vst [vmem:[#allocation15_spill] sm:$0xff] %v5957_v48  ;;  %6649 = vst [vmem:[#allocation16_spill] sm:$0xff] %v5959_v28  ;;  %v3966_v54 = vsel %vm1085_vm2, %v5877_v40, -inf  ;;  %v3969_v55 = vsel %vm1085_vm2, %v5951_v43, -inf }
 0x411   :  { %6642 = vst [vmem:[#allocation9_spill] sm:$0xff] %v5914_v63  ;;  %6643 = vst [vmem:[#allocation10_spill] sm:$0xff] %v5917_v16  ;;  %v5967_v2 = vpop.f32.mrf.mxu0 }
 0x412   :  { %6644 = vst [vmem:[#allocation11_spill] sm:$0xff] %v5920_v23  ;;  %6645 = vst [vmem:[#allocation12_spill] sm:$0xff] %v5923_v31  ;;  %v3975_v30 = vsel %vm1085_vm2, %v5967_v2, -inf  ;;  %v6015_v31 = vpop.permute.xlu1 %3025 }
 0x413   :  { %3964 = vmax.xlane.f32.xlu0 %v3963_v14  ;;  %v5965_v14 = vpop.f32.mrf.mxu1  ;;  %6651 = vst [vmem:[#allocation18_spill] sm:$0xff] %v5967_v2  ;;  %v5975_v18 = vpop.f32.mrf.mxu0  ;;  %6659 = vst [vmem:[#allocation26_spill] sm:$0xff] %v6015_v31 }
 0x414   :  { %1870 = vadd.xlane.f32.xlu1 %v1869_v15  ;;  %6650 = vst [vmem:[#allocation17_spill] sm:$0xff] %v5965_v14  ;;  %v3984_v15 = vsel %vm1085_vm2, %v5909_v13, -inf  ;;  %v3993_v29 = vsel %vm1085_vm2, %v5965_v14, -inf  ;;  %6653 = vst [vmem:[#allocation20_spill] sm:$0xff] %v5975_v18 }
 0x415   :  { %v5983_v53 = vpop.f32.mrf.mxu0 }
 0x416   :  { %6655 = vst [vmem:[#allocation22_spill] sm:$0xff] %v5983_v53  ;;  %v3987_v9 = vsel %vm1085_vm2, %v5983_v53, -inf }
 0x417   :  { %3982 = vmax.xlane.f32.xlu0 %v3981_v10  ;;  %v5973_v10 = vpop.f32.mrf.mxu1 }
 0x418   :  { %3967 = vmax.xlane.f32.xlu1 %v3966_v54  ;;  %6652 = vst [vmem:[#allocation19_spill] sm:$0xff] %v5973_v10  ;;  %v3972_v54 = vsel %vm1085_vm2, %v5911_v25, -inf  ;;  %v830_v25 = vcombine.high %v5785_v20, %v5789_v3 }
 0x41b   :  { %3970 = vmax.xlane.f32.xlu0 %v3969_v55  ;;  %v5981_v55 = vpop.f32.mrf.mxu1 }
 0x41c   :  { %3985 = vmax.xlane.f32.xlu1 %v3984_v15  ;;  %6654 = vst [vmem:[#allocation21_spill] sm:$0xff] %v5981_v55  ;;  %v3996_v15 = vsel %vm1085_vm2, %v5957_v48, -inf  ;;  %v4005_v52 = vsel %vm1085_vm2, %v5981_v55, -inf }
 0x41f   :  { %3994 = vmax.xlane.f32.xlu0 %v3993_v29  ;;  %v5989_v29 = vpop.f32.mrf.mxu0 }
 0x420   :  { %3973 = vmax.xlane.f32.xlu1 %v3972_v54  ;;  %6656 = vst [vmem:[#allocation23_spill] sm:$0xff] %v5989_v29  ;;  %v3978_v54 = vsel %vm1085_vm2, %v5959_v28, -inf }
 0x421   :  { %v5995_v39 = vpop.f32.mrf.mxu0 }
 0x422   :  { %6657 = vst [vmem:[#allocation24_spill] sm:$0xff] %v5995_v39 }
 0x423   :  { %3976 = vmax.xlane.f32.xlu0 %v3975_v30  ;;  %v4008_v30 = vsel %vm1085_vm2, %v5973_v10, -inf }
 0x424   :  { %3997 = vmax.xlane.f32.xlu1 %v3996_v15  ;;  %v3999_v15 = vsel %vm1085_vm2, %v5995_v39, -inf  ;;  %v813_v39 = vcombine.low %v5650_v46, %v5783_v8 }
 0x426   :  { %v821_v16 = vrot.slane %v813_v39, %v5041_v33  ;;  %v862_v39 = vcombine.high %v5793_v58, %v5797_v38 }
 0x427   :  { %4006 = vmax.xlane.f32.xlu0 %v4005_v52  ;;  %v3990_v52 = vsel %vm1085_vm2, %v5975_v18, -inf }
 0x428   :  { %3979 = vmax.xlane.f32.xlu1 %v3978_v54  ;;  %v4002_v54 = vsel %vm1085_vm2, %v5989_v29, -inf  ;;  %v861_v29 = vcombine.low %v5793_v58, %v5797_v38  ;;  %v814_v58 = vcombine.high %v5650_v46, %v5783_v8  ;;  %v876_v38 = vrot.slane %v862_v39, %v5041_v33 }
 0x42b   :  { %3988 = vmax.xlane.f32.xlu0 %v3987_v9  ;;  %v997_v9 = vcombine.low %v5803_v22, %v5807_v24 }
 0x42c   :  { %4009 = vmax.xlane.f32.xlu1 %v4008_v30  ;;  %v981_v30 = vcombine.low %v5805_v21, %v5809_v56 }
 0x42d   :  { %v6022_v34 = vrot.slane %v997_v9, %v5041_v33  ;;  %v829_v9 = vcombine.low %v5785_v20, %v5789_v3  ;;  %v998_v20 = vcombine.high %v5803_v22, %v5807_v24  ;;  %v966_v22 = vcombine.high %v5795_v36, %v5799_v60 }
 0x42e   :  { %v828_v24 = vrot.slane %v814_v58, %v5041_v33 }
 0x42f   :  { %4000 = vmax.xlane.f32.xlu0 %v3999_v15  ;;  %v6013_v15 = vpop.permute.xlu0 %3022 }
 0x430   :  { %3991 = vmax.xlane.f32.xlu1 %v3990_v52  ;;  %6658 = vst [vmem:[#allocation25_spill] sm:$0xff] %v6013_v15  ;;  %v965_v52 = vcombine.low %v5795_v36, %v5799_v60 }
 0x432   :  { %v6030_v15 = vrot.slane %v965_v52, %v5041_v33  ;;  %v869_v52 = vrot.slane %v861_v29, %v5041_v33 }
 0x433   :  { %v6035_v47 = vpop.permute.xlu0 %3028 }
 0x434   :  { %4003 = vmax.xlane.f32.xlu1 %v4002_v54  ;;  %v949_v54 = vcombine.low %v5694_v57, %v5801_v41  ;;  %6660 = vst [vmem:[#allocation27_spill] sm:$0xff] %v6035_v47 }
 0x436   :  { %v6033_v31 = vrot.slane %v949_v54, %v5041_v33 }
 0x438   :  { %v1013_v54 = vcombine.low %v6033_v31, %v6030_v15 }
 0x43a   :  { %v6055_v28 = vrot.slane %v1013_v54, %v5050_v45 }
 0x445   :  { %3031 = vrot.lane.b32.xlu1 %v5773_v37, %s4905_s24  ;;  %3034 = vrot.lane.b32.xlu0 %v5773_v37, %s4908_s27  ;;  %v6025_v37 = vrot.slane %v981_v30, %v5041_v33  ;;  %v845_v30 = vcombine.low %v5787_v49, %v5791_v6 }
 0x447   :  { %v1045_v18 = vcombine.low %v6025_v37, %v6022_v34  ;;  %v853_v47 = vrot.slane %v845_v30, %v5041_v33  ;;  %v1046_v3 = vcombine.high %v6025_v37, %v6022_v34  ;;  %v1014_v37 = vcombine.high %v6033_v31, %v6030_v15 }
 0x448   :  { %v1012_v34 = vrot.slane %v998_v20, %v5041_v33 }
 0x449   :  { %v6051_v53 = vrot.slane %v1045_v18, %v5050_v45  ;;  %v909_v51 = vcombine.low %v853_v47, %v869_v52  ;;  %v910_v30 = vcombine.high %v853_v47, %v869_v52  ;;  %v6102_v52 = vrot.slane %v1046_v3, %v5050_v45 }
 0x44b   :  { %v1077_v29 = vcombine.low %v6055_v28, %v6051_v53  ;;  %v917_v63 = vrot.slane %v909_v51, %v5050_v45  ;;  %v846_v51 = vcombine.high %v5787_v49, %v5791_v6  ;;  %v6075_v47 = vrot.slane %v910_v30, %v5050_v45 }
 0x44c   :  { %v982_v49 = vcombine.high %v5805_v21, %v5809_v56  ;;  %v950_v21 = vcombine.high %v5694_v57, %v5801_v41 }
 0x44d   :  { %v860_v8 = vrot.slane %v846_v51, %v5041_v33 }
 0x44f   :  { %v925_v56 = vcombine.low %v860_v8, %v876_v38 }
 0x451   :  { %v933_v39 = vrot.slane %v925_v56, %v5050_v45 }
 0x474   :  { %v1835_v23 = vpop.xlane.xlu1 %1834 }
 0x475   :  { %4783 = vrcp.f32 %v1835_v23  ;;  %v837_v23 = vrot.slane %v829_v9, %v5041_v33  ;;  %v1895_v9 = vmul.f32 %v5816_v44, %v1077_v29  ;;  %v964_v29 = vrot.slane %v950_v21, %v5041_v33 }
 0x477   :  { %v877_v55 = vcombine.low %v821_v16, %v837_v23  ;;  %v878_v14 = vcombine.high %v821_v16, %v837_v23  ;;  %v844_v16 = vrot.slane %v830_v25, %v5041_v33  ;;  %v980_v23 = vrot.slane %v966_v22, %v5041_v33 }
 0x479   :  { %v1832_v10 = vpop.xlane.xlu0 %1831  ;;  %v885_v18 = vrot.slane %v877_v55, %v5050_v45  ;;  %v6087_v46 = vrot.slane %v878_v14, %v5050_v45  ;;  %v996_v14 = vrot.slane %v982_v49, %v5041_v33  ;;  %v893_v60 = vcombine.low %v828_v24, %v844_v16 }
 0x47a   :  { %4785 = vrcp.f32 %v1832_v10  ;;  %v894_v57 = vcombine.high %v828_v24, %v844_v16 }
 0x47b   :  { %v941_v54 = vcombine.low %v885_v18, %v917_v63  ;;  %v944_v25 = vcombine.high %v6087_v46, %v6075_v47  ;;  %v942_v30 = vcombine.high %v885_v18, %v917_v63  ;;  %v1061_v51 = vcombine.low %v996_v14, %v1012_v34 }
 0x47c   :  { %v908_v49 = vrot.slane %v894_v57, %v5050_v45  ;;  %v1062_v16 = vcombine.high %v996_v14, %v1012_v34  ;;  %v943_v14 = vcombine.low %v6087_v46, %v6075_v47 }
 0x47d   :  { %v1900_v41 = vmul.f32 %v5832_v32, %v944_v25  ;;  %v1069_v22 = vrot.slane %v1061_v51, %v5050_v45 }
 0x47e   :  { %v1076_v57 = vrot.slane %v1062_v16, %v5050_v45 }
 0x480   :  { %v1850_v11 = vpop.xlane.xlu0 %1849 }
 0x481   :  { %4787 = vrcp.f32 %v1850_v11  ;;  %v1894_v11 = vmul.f32 %v5823_v62, %v941_v54 }
 0x482   :  { %v4784_v10 = vpop.eup %4783 }
 0x483   :  { %v6064_v48 = vmul.f32 %v4784_v10, %v1895_v9  ;;  %v6108_v9 = vrot.slane %v1014_v37, %v5050_v45  ;;  %v926_v10 = vcombine.high %v860_v8, %v876_v38  ;;  %v1029_v38 = vcombine.low %v964_v29, %v980_v23 }
 0x484   :  { %v1838_v2 = vpop.xlane.xlu0 %1837 }
 0x485   :  { %4789 = vrcp.f32 %v1838_v2  ;;  %v1853_v44 = vpop.xlane.xlu1 %1852  ;;  %v1080_v32 = vcombine.high %v6108_v9, %v6102_v52  ;;  %v940_v18 = vrot.slane %v926_v10, %v5050_v45  ;;  %v1079_v47 = vcombine.low %v6108_v9, %v6102_v52 }
 0x486   :  { %4791 = vrcp.f32 %v1853_v44 }
 0x487   :  { %v4786_v55 = vpop.eup %4785  ;;  %v1901_v3 = vmul.f32 %v5840_v59, %v1080_v32 }
 0x488   :  { %v6083_v6 = vmul.f32 %v4786_v55, %v1894_v11  ;;  %v1862_v62 = vpop.xlane.xlu0 %1861  ;;  %v901_v11 = vrot.slane %v893_v60, %v5050_v45  ;;  %v1896_v55 = vmul.f32 %v5837_v27, %v942_v30  ;;  %v1078_v27 = vcombine.high %v6055_v28, %v6051_v53 }
 0x489   :  { %4793 = vrcp.f32 %v1862_v62  ;;  %v1841_v2 = vpop.xlane.xlu1 %1840 }
 0x48a   :  { %4795 = vrcp.f32 %v1841_v2  ;;  %v946_v62 = vcombine.high %v901_v11, %v933_v39  ;;  %v1030_v2 = vcombine.high %v964_v29, %v980_v23  ;;  %v1897_v53 = vmul.f32 %v5847_v5, %v1078_v27 }
 0x48b   :  { %v945_v60 = vcombine.low %v901_v11, %v933_v39  ;;  %v1898_v5 = vmul.f32 %v5854_v50, %v943_v14 }
 0x48c   :  { %v1844_v36 = vpop.xlane.xlu0 %1843  ;;  %v1904_v24 = vmul.f32 %v5849_v35, %v946_v62  ;;  %v947_v35 = vcombine.low %v908_v49, %v940_v18 }
 0x48d   :  { %4797 = vrcp.f32 %v1844_v36  ;;  %v1865_v31 = vpop.xlane.xlu1 %1864  ;;  %v1037_v36 = vrot.slane %v1029_v38, %v5050_v45 }
 0x48e   :  { %v4788_v15 = vpop.eup %4787  ;;  %4799 = vrcp.f32 %v1865_v31  ;;  %v948_v31 = vcombine.high %v908_v49, %v940_v18  ;;  %v1902_v49 = vmul.f32 %v5875_v7, %v945_v60  ;;  %v1906_v50 = vmul.f32 %v5888_v1, %v947_v35 }
 0x48f   :  { %v6111_v54 = vmul.f32 %v4788_v15, %v1900_v41  ;;  %v1044_v15 = vrot.slane %v1030_v2, %v5050_v45  ;;  %v1082_v23 = vcombine.high %v1037_v36, %v1069_v22  ;;  %v1081_v46 = vcombine.low %v1037_v36, %v1069_v22 }
 0x490   :  { %v1874_v44 = vpop.xlane.xlu0 %1873 }
 0x491   :  { %4801 = vrcp.f32 %v1874_v44  ;;  %v1847_v58 = vpop.xlane.xlu1 %1846  ;;  %v1083_v11 = vcombine.low %v1044_v15, %v1076_v57  ;;  %v1903_v52 = vmul.f32 %v5881_v17, %v1081_v46 }
 0x492   :  { %v4790_v20 = vpop.eup %4789  ;;  %4803 = vrcp.f32 %v1847_v58 }
 0x493   :  { %v4792_v63 = vpop.eup %4791  ;;  %v6120_v8 = vmul.f32 %v4790_v20, %v1896_v55  ;;  %v1084_v55 = vcombine.high %v1044_v15, %v1076_v57  ;;  %v1899_v20 = vmul.f32 %v5869_v12, %v1079_v47  ;;  %v6153_v12 = vmul.f32 %v5907_v19, %v1083_v11 }
 0x494   :  { %v1917_v21 = vmul.f32 %v4792_v63, %v1901_v3  ;;  %v1856_v37 = vpop.xlane.xlu0 %1855 }
 0x495   :  { %4805 = vrcp.f32 %v1856_v37  ;;  %v1877_v59 = vpop.xlane.xlu1 %1876  ;;  %v1942_v56 = vcombine.low %v6120_v8, %v6111_v54  ;;  %v1943_v25 = vcombine.high %v6120_v8, %v6111_v54  ;;  %v1905_v54 = vmul.f32 %v5859_v4, %v1082_v23 }
 0x496   :  { %v4794_v34 = vpop.eup %4793  ;;  %4807 = vrcp.f32 %v1877_v59  ;;  %v1908_v4 = vmul.f32 %v5871_v26, %v948_v31  ;;  %v1909_v7 = vmul.f32 %v5883_v0, %v1084_v55 }
 0x497   :  { %v4796_v28 = vpop.eup %4795  ;;  %v6135_v41 = vmul.f32 %v4794_v34, %v1904_v24  ;;  %v1950_v17 = vrot.slane %v1942_v56, %v5041_v33 }
 0x498   :  { %v1913_v29 = vmul.f32 %v4796_v28, %v1897_v53  ;;  %v1868_v10 = vpop.xlane.xlu0 %1867 }
 0x499   :  { %4809 = vrcp.f32 %v1868_v10  ;;  %v1859_v30 = vpop.xlane.xlu1 %1858 }
 0x49a   :  { %v4798_v39 = vpop.eup %4797  ;;  %4811 = vrcp.f32 %v1859_v30  ;;  %v2078_v51 = vcombine.low %v1913_v29, %v1917_v21  ;;  %v2079_v32 = vcombine.high %v1913_v29, %v1917_v21 }
 0x49b   :  { %v4800_v44 = vpop.eup %4799  ;;  %v1914_v58 = vmul.f32 %v4798_v39, %v1898_v5 }
 0x49c   :  { %v6146_v9 = vmul.f32 %v4800_v44, %v1905_v54  ;;  %v3965_v38 = vpop.xlane.xlu0 %3964  ;;  %v2086_v21 = vrot.slane %v2078_v51, %v5041_v33  ;;  %v6162_v19 = vrot.slane %v2079_v32, %v5041_v33 }
 0x49d   :  { %v4011_v3 = vsub.f32 %v5890_v42, %v3965_v38  ;;  %v1871_v63 = vpop.xlane.xlu1 %1870  ;;  %v1926_v18 = vcombine.low %v6083_v6, %v1914_v58  ;;  %v1927_v62 = vcombine.high %v6083_v6, %v1914_v58  ;;  %v1957_v6 = vrot.slane %v1943_v25, %v5041_v33 }
 0x49e   :  { %v4802_v16 = vpop.eup %4801  ;;  %4813 = vrcp.f32 %v1871_v63  ;;  %v6662_v63 = vld [vmem:[#allocation8_spill] sm:$0xff] }
 0x49f   :  { %v4804_v1 = vpop.eup %4803  ;;  %v1924_v8 = vmul.f32 %v4802_v16, %v1908_v4  ;;  %v4027_v2 = vmul.f32 1.442695, %v4011_v3  ;;  %v1934_v26 = vrot.slane %v1926_v18, %v5041_v33  ;;  %v1941_v42 = vrot.slane %v1927_v62, %v5041_v33 }
 0x4a0   :  { %v1915_v22 = vmul.f32 %v4804_v1, %v1899_v20  ;;  %v3983_v27 = vpop.xlane.xlu0 %3982 }
 0x4a1   :  { %4815 = vpow2.f32 %v4027_v2  ;;  %v4017_v0 = vsub.f32 %v5949_v61, %v3983_v27  ;;  %v3968_v37 = vpop.xlane.xlu1 %3967  ;;  %v1974_v24 = vcombine.low %v6135_v41, %v1924_v8  ;;  %v1990_v59 = vcombine.low %v1934_v26, %v1950_v17  ;;  %v6663_v27 = vld [vmem:[#allocation18_spill] sm:$0xff] }
 0x4a2   :  { %v4806_v56 = vpop.eup %4805  ;;  %v4012_v34 = vsub.f32 %v5877_v40, %v3968_v37  ;;  %v1991_v14 = vcombine.high %v1934_v26, %v1950_v17  ;;  %v1975_v36 = vcombine.high %v6135_v41, %v1924_v8  ;;  %v2006_v53 = vcombine.low %v1941_v42, %v1957_v6 }
 0x4a3   :  { %v4808_v25 = vpop.eup %4807  ;;  %v1918_v28 = vmul.f32 %v4806_v56, %v1902_v49  ;;  %v4039_v60 = vmul.f32 1.442695, %v4017_v0  ;;  %v6169_v35 = vrot.slane %v1974_v24, %v5041_v33  ;;  %v6172_v57 = vrot.slane %v1990_v59, %v5050_v45  ;;  %v6661_v49 = vld [vmem:[#allocation17_spill] sm:$0xff] }
 0x4a4   :  { %v6174_v61 = vmul.f32 %v4808_v25, %v1909_v7  ;;  %v4029_v31 = vmul.f32 1.442695, %v4012_v34  ;;  %v3971_v15 = vpop.xlane.xlu0 %3970  ;;  %v6177_v23 = vrot.slane %v1991_v14, %v5050_v45  ;;  %v1989_v40 = vrot.slane %v1975_v36, %v5041_v33  ;;  %v6665_v14 = vld [vmem:[#allocation6_spill] sm:$0xff]  ;;  %v6666_v36 = vld [vmem:[#allocation9_spill] sm:$0xff] }
 0x4a5   :  { %4817 = vpow2.f32 %v4039_v60  ;;  %v4013_v41 = vsub.f32 %v5951_v43, %v3971_v15  ;;  %v3986_v29 = vpop.xlane.xlu1 %3985  ;;  %v6182_v10 = vrot.slane %v2006_v53, %v5050_v45  ;;  %v2007_v47 = vcombine.high %v1941_v42, %v1957_v6 }
 0x4a6   :  { %v4810_v46 = vpop.eup %4809  ;;  %4819 = vpow2.f32 %v4029_v31  ;;  %v4018_v5 = vsub.f32 %v5909_v13, %v3986_v29  ;;  %v2062_v30 = vcombine.low %v6064_v48, %v1915_v22  ;;  %v2110_v39 = vcombine.low %v6146_v9, %v6174_v61 }
 0x4a7   :  { %v4812_v54 = vpop.eup %4811  ;;  %v1922_v51 = vmul.f32 %v4810_v46, %v1906_v50  ;;  %v4031_v32 = vmul.f32 1.442695, %v4013_v41  ;;  %v6189_v44 = vrot.slane %v2007_v47, %v5050_v45  ;;  %v2063_v43 = vcombine.high %v6064_v48, %v1915_v22  ;;  %v6668_v47 = vld [vmem:[#allocation21_spill] sm:$0xff] }
 0x4a8   :  { %v6192_v11 = vmul.f32 %v4812_v54, %v1903_v52  ;;  %v4041_v55 = vmul.f32 1.442695, %v4018_v5  ;;  %v3995_v58 = vpop.xlane.xlu0 %3994  ;;  %v2070_v20 = vrot.slane %v2062_v30, %v5041_v33  ;;  %v6196_v13 = vrot.slane %v2110_v39, %v5041_v33 }
 0x4a9   :  { %4821 = vpow2.f32 %v4031_v32  ;;  %v4021_v38 = vsub.f32 %v6661_v49, %v3995_v58  ;;  %v3974_v4 = vpop.xlane.xlu1 %3973  ;;  %v1958_v50 = vcombine.low %v1918_v28, %v1922_v51  ;;  %v1959_v3 = vcombine.high %v1918_v28, %v1922_v51  ;;  %v6669_v51 = vld [vmem:[#allocation16_spill] sm:$0xff]  ;;  %v6671_v49 = vld [vmem:[#allocation10_spill] sm:$0xff] }
 0x4aa   :  { %4823 = vpow2.f32 %v4041_v55  ;;  %v4014_v18 = vsub.f32 %v6662_v63, %v3974_v4  ;;  %v2126_v62 = vcombine.low %v2070_v20, %v2086_v21  ;;  %v2127_v48 = vcombine.high %v2070_v20, %v2086_v21  ;;  %v6670_v20 = vld [vmem:[#allocation7_spill] sm:$0xff] }
 0x4ab   :  { %v4814_v52 = vpop.eup %4813  ;;  %v4047_v16 = vmul.f32 1.442695, %v4021_v38  ;;  %v1966_v7 = vrot.slane %v1958_v50, %v5041_v33  ;;  %v1973_v17 = vrot.slane %v1959_v3, %v5041_v33  ;;  %v6203_v1 = vrot.slane %v2063_v43, %v5041_v33 }
 0x4ac   :  { %v6206_v8 = vmul.f32 %v4814_v52, %v6153_v12  ;;  %v4033_v2 = vmul.f32 1.442695, %v4014_v18  ;;  %v3977_v26 = vpop.xlane.xlu0 %3976  ;;  %v6209_v42 = vrot.slane %v2126_v62, %v5050_v45  ;;  %v6212_v22 = vrot.slane %v2127_v48, %v5050_v45  ;;  %v6664_v12 = vld [vmem:[#allocation15_spill] sm:$0xff] }
 0x4ad   :  { %4825 = vpow2.f32 %v4047_v16  ;;  %v4015_v6 = vsub.f32 %v6663_v27, %v3977_v26  ;;  %v3998_v21 = vpop.xlane.xlu1 %3997  ;;  %v2022_v0 = vcombine.low %v1966_v7, %v6169_v35  ;;  %v2023_v37 = vcombine.high %v1966_v7, %v6169_v35  ;;  %v6673_v7 = vld [vmem:[#allocation22_spill] sm:$0xff] }
 0x4ae   :  { %v4816_v24 = vpop.eup %4815  ;;  %4827 = vpow2.f32 %v4033_v2  ;;  %v4022_v59 = vsub.f32 %v6664_v12, %v3998_v21  ;;  %v2038_v56 = vcombine.low %v1973_v17, %v1989_v40  ;;  %v2039_v34 = vcombine.high %v1973_v17, %v1989_v40  ;;  %v6674_v21 = vld [vmem:[#allocation19_spill] sm:$0xff] }
 0x4af   :  { %v6667_v53 = vcombine.low %v6665_v14, %v6666_v36  ;;  %v4035_v28 = vmul.f32 1.442695, %v4015_v6  ;;  %v4059_v60 = vsel %vm1085_vm2, %v4816_v24, 0.0  ;;  %v6225_v31 = vrot.slane %v2022_v0, %v5050_v45 }
 0x4b0   :  { %v4049_v15 = vmul.f32 1.442695, %v4022_v59  ;;  %4060 = vadd.xlane.f32.xlu0 %v4059_v60  ;;  %v4007_v35 = vpop.xlane.xlu0 %4006  ;;  %v6228_v41 = vrot.slane %v2023_v37, %v5050_v45  ;;  %v6231_v29 = vrot.slane %v2038_v56, %v5050_v45  ;;  %v6234_v40 = vrot.slane %v2039_v34, %v5050_v45 }
 0x4b1   :  { %v6221_v25 = vmul.f32 %v4816_v24, %v6667_v53  ;;  %4829 = vpow2.f32 %v4035_v28  ;;  %v4025_v46 = vsub.f32 %v6668_v47, %v4007_v35  ;;  %v3980_v5 = vpop.xlane.xlu1 %3979  ;;  %v2055_v30 = vcombine.high %v6172_v57, %v6225_v31 }
 0x4b2   :  { %v2094_v39 = vcombine.low %v6192_v11, %v6206_v8  ;;  %v4818_v54 = vpop.eup %4817  ;;  %4831 = vpow2.f32 %v4049_v15  ;;  %v4016_v32 = vsub.f32 %v6669_v51, %v3980_v5  ;;  %v2056_v43 = vcombine.low %v6177_v23, %v6228_v41  ;;  %v6677_v5 = vld [vmem:[#allocation20_spill] sm:$0xff] }
 0x4b3   :  { %v2057_v55 = vcombine.high %v6177_v23, %v6228_v41  ;;  %v6246_v58 = vpop.eup %4819  ;;  %v6672_v38 = vcombine.high %v6670_v20, %v6671_v49  ;;  %v4055_v50 = vmul.f32 1.442695, %v4025_v46  ;;  %v4077_v3 = vsel %vm1085_vm2, %v4818_v54, 0.0 }
 0x4b4   :  { %v2058_v63 = vcombine.low %v6182_v10, %v6231_v29  ;;  %v4037_v18 = vmul.f32 1.442695, %v4016_v32  ;;  %4078 = vadd.xlane.f32.xlu0 %v4077_v3  ;;  %v3989_v62 = vpop.xlane.xlu0 %3988  ;;  %v4062_v48 = vsel %vm1085_vm2, %v6246_v58, 0.0  ;;  %v2059_v52 = vcombine.high %v6182_v10, %v6231_v29  ;;  %v6678_v32 = vld [vmem:[#allocation13_spill] sm:$0xff] }
 0x4b5   :  { %v6251_v4 = vmul.f32 %v4818_v54, %v6672_v38  ;;  %v2060_v16 = vcombine.low %v6189_v44, %v6234_v40  ;;  %4833 = vpow2.f32 %v4055_v50  ;;  %v4019_v17 = vsub.f32 %v6673_v7, %v3989_v62  ;;  %4063 = vadd.xlane.f32.xlu1 %v4062_v48  ;;  %v4010_v2 = vpop.xlane.xlu1 %4009  ;;  %v6679_v38 = vld [vmem:[#allocation11_spill] sm:$0xff] }
 0x4b6   :  { %v2061_v26 = vcombine.high %v6189_v44, %v6234_v40  ;;  %v2102_v27 = vrot.slane %v2094_v39, %v5041_v33  ;;  %v4822_v6 = vpop.eup %4821  ;;  %4835 = vpow2.f32 %v4037_v18  ;;  %v4026_v0 = vsub.f32 %v6674_v21, %v4010_v2 }
 0x4b7   :  { %v2095_v37 = vcombine.high %v6192_v11, %v6206_v8  ;;  %v2111_v24 = vcombine.high %v6146_v9, %v6174_v61  ;;  %v6271_v12 = vpop.eup %4823  ;;  %v6675_v59 = vcombine.high %v6665_v14, %v6666_v36  ;;  %v4043_v34 = vmul.f32 1.442695, %v4019_v17  ;;  %v6676_v8 = vld [vmem:[#allocation24_spill] sm:$0xff] }
 0x4b8   :  { %v4065_v53 = vsel %vm1085_vm2, %v4822_v6, 0.0  ;;  %v2158_v28 = vcombine.low %v2102_v27, %v6196_v13  ;;  %v4057_v60 = vmul.f32 1.442695, %v4026_v0  ;;  %v4001_v15 = vpop.xlane.xlu0 %4000  ;;  %v4080_v11 = vsel %vm1085_vm2, %v6271_v12, 0.0 }
 0x4b9   :  { %v6276_v56 = vmul.f32 %v4822_v6, %v6675_v59  ;;  %4066 = vadd.xlane.f32.xlu0 %v4065_v53  ;;  %v2159_v9 = vcombine.high %v2102_v27, %v6196_v13  ;;  %v2109_v61 = vrot.slane %v2095_v37, %v5041_v33  ;;  %4837 = vpow2.f32 %v4043_v34  ;;  %4081 = vadd.xlane.f32.xlu1 %v4080_v11  ;;  %v3992_v36 = vpop.xlane.xlu1 %3991  ;;  %v6681_v59 = vld [vmem:[#allocation23_spill] sm:$0xff] }
 0x4ba   :  { %v4023_v14 = vsub.f32 %v6676_v8, %v4001_v15  ;;  %v6286_v35 = vrot.slane %v2158_v28, %v5050_v45  ;;  %v2125_v47 = vrot.slane %v2111_v24, %v5041_v33  ;;  %v4826_v46 = vpop.eup %4825  ;;  %4839 = vpow2.f32 %v4057_v60 }
 0x4bb   :  { %v4020_v39 = vsub.f32 %v6677_v5, %v3992_v36  ;;  %v6291_v54 = vrot.slane %v2159_v9, %v5050_v45  ;;  %v2142_v13 = vcombine.low %v6203_v1, %v6162_v19  ;;  %v6295_v51 = vpop.eup %4827  ;;  %v6680_v50 = vcombine.high %v6678_v32, %v6679_v38 }
 0x4bc   :  { %v4051_v18 = vmul.f32 1.442695, %v4023_v14  ;;  %v4089_v62 = vsel %vm1085_vm2, %v4826_v46, 0.0  ;;  %v2191_v48 = vcombine.high %v6209_v42, %v6286_v35  ;;  %v4068_v17 = vsel %vm1085_vm2, %v6295_v51, 0.0  ;;  %v6408_v23 = vpop.permute.xlu0 %3034 }
 0x4bd   :  { %v6300_v3 = vmul.f32 %v4826_v46, %v6680_v50  ;;  %v4045_v7 = vmul.f32 1.442695, %v4020_v39  ;;  %4090 = vadd.xlane.f32.xlu0 %v4089_v62  ;;  %v2192_v2 = vcombine.low %v6212_v22, %v6291_v54  ;;  %v2193_v27 = vcombine.high %v6212_v22, %v6291_v54  ;;  %4069 = vadd.xlane.f32.xlu1 %v4068_v17  ;;  %v4004_v6 = vpop.xlane.xlu1 %4003  ;;  %v6683_v39 = vld [vmem:[#allocation14_spill] sm:$0xff]  ;;  %v6684_v54 = vld [vmem:[#allocation12_spill] sm:$0xff] }
 0x4be   :  { %4841 = vpow2.f32 %v4051_v18  ;;  %v2150_v21 = vrot.slane %v2142_v13, %v5050_v45  ;;  %v2174_v0 = vcombine.low %v2109_v61, %v2125_v47  ;;  %v2143_v37 = vcombine.high %v6203_v1, %v6162_v19  ;;  %v4830_v24 = vpop.eup %4829 }
 0x4bf   :  { %4843 = vpow2.f32 %v4045_v7  ;;  %v4024_v34 = vsub.f32 %v6681_v59, %v4004_v6  ;;  %v2175_v53 = vcombine.high %v2109_v61, %v2125_v47  ;;  %v2054_v28 = vcombine.low %v6172_v57, %v6225_v31  ;;  %v6317_v60 = vpop.eup %4831 }
 0x4c0   :  { %v6682_v22 = vcombine.low %v6670_v20, %v6671_v49  ;;  %v4071_v11 = vsel %vm1085_vm2, %v4830_v24, 0.0  ;;  %v2182_v9 = vrot.slane %v2174_v0, %v5050_v45  ;;  %v2157_v19 = vrot.slane %v2143_v37, %v5050_v45 }
 0x4c1   :  { %v4053_v1 = vmul.f32 1.442695, %v4024_v34  ;;  %4072 = vadd.xlane.f32.xlu0 %v4071_v11  ;;  %v4092_v61 = vsel %vm1085_vm2, %v6317_v60, 0.0  ;;  %v2189_v8 = vrot.slane %v2175_v53, %v5050_v45  ;;  %v2190_v14 = vcombine.low %v6209_v42, %v6286_v35  ;;  %v6410_v44 = vpop.permute.xlu1 %3031 }
 0x4c2   :  { %v6322_v15 = vmul.f32 %v4830_v24, %v6682_v22  ;;  %4093 = vadd.xlane.f32.xlu1 %v4092_v61  ;;  %v2194_v20 = vcombine.low %v2150_v21, %v2182_v9  ;;  %v2195_v49 = vcombine.high %v2150_v21, %v2182_v9  ;;  %v4834_v36 = vpop.eup %4833  ;;  %v6685_v13 = vcombine.high %v6683_v39, %v6684_v54  ;;  %v6688_v9 = vld [vmem:[#allocation5_spill] sm:$0xff] }
 0x4c3   :  { %4845 = vpow2.f32 %v4053_v1  ;;  %v2196_v47 = vcombine.low %v2157_v19, %v2189_v8  ;;  %v2197_v46 = vcombine.high %v2157_v19, %v2189_v8  ;;  %v6332_v5 = vpop.eup %4835  ;;  %v4101_v18 = vsel %vm1085_vm2, %v4834_v36, 0.0  ;;  %v6689_v1 = vld [vmem:[#allocation26_spill] sm:$0xff] }
 0x4c4   :  { %v6337_v50 = vmul.f32 %v4834_v36, %v6685_v13  ;;  %v4074_v62 = vsel %vm1085_vm2, %v6332_v5, 0.0  ;;  %v6686_v6 = vcombine.low %v6678_v32, %v6679_v38  ;;  %v6687_v34 = vcombine.low %v6683_v39, %v6684_v54  ;;  %v6691_v39 = vld [vmem:[#allocation25_spill] sm:$0xff] }
 0x4c5   :  { %4102 = vadd.xlane.f32.xlu0 %v4101_v18  ;;  %v3179_v61 = vcombine.low %v6688_v9, %v6689_v1 }
 0x4c6   :  { %4075 = vadd.xlane.f32.xlu1 %v4074_v62  ;;  %v4838_v7 = vpop.eup %4837 }
 0x4c7   :  { %v6342_v17 = vpop.eup %4839  ;;  %v6347_v21 = vmul.f32 %v4838_v7, %v6686_v6  ;;  %v4083_v0 = vsel %vm1085_vm2, %v4838_v7, 0.0 }
 0x4c8   :  { %v4104_v37 = vsel %vm1085_vm2, %v6342_v17, 0.0 }
 0x4c9   :  { %4084 = vadd.xlane.f32.xlu0 %v4083_v0 }
 0x4ca   :  { %4105 = vadd.xlane.f32.xlu1 %v4104_v37 }
 0x4cb   :  { %v4842_v24 = vpop.eup %4841 }
 0x4cc   :  { %v6352_v59 = vpop.eup %4843  ;;  %v6357_v53 = vmul.f32 %v4842_v24, %v6687_v34  ;;  %v4095_v22 = vsel %vm1085_vm2, %v4842_v24, 0.0 }
 0x4cd   :  { %4096 = vadd.xlane.f32.xlu0 %v4095_v22  ;;  %v4086_v32 = vsel %vm1085_vm2, %v6352_v59, 0.0 }
 0x4ce   :  { %4087 = vadd.xlane.f32.xlu1 %v4086_v32 }
 0x4d0   :  { %v6362_v38 = vpop.eup %4845 }
 0x4d1   :  { %v4098_v11 = vsel %vm1085_vm2, %v6362_v38, 0.0 }
 0x4d2   :  { %4099 = vadd.xlane.f32.xlu1 %v4098_v11 }
 0x4e3   :  { %3037 = vrot.lane.b32.xlu1 %v6688_v9, %s4907_s26  ;;  %3040 = vrot.lane.b32.xlu0 %v6688_v9, %s4909_s30 }
 0x4e7   :  { %2199 = vrot.lane.b32.xlu1 %v2055_v30, %s4909_s30  ;;  %2203 = vrot.lane.b32.xlu0 %v2056_v43, %s4907_s26 }
 0x4eb   :  { %2207 = vrot.lane.b32.xlu1 %v2057_v55, %s4908_s27  ;;  %2211 = vrot.lane.b32.xlu0 %v2058_v63, %s4905_s24 }
 0x4ef   :  { %2215 = vrot.lane.b32.xlu1 %v2059_v52, %s4906_s25  ;;  %2219 = vrot.lane.b32.xlu0 %v2060_v16, %s4903_s22 }
 0x4f3   :  { %2223 = vrot.lane.b32.xlu1 %v2061_v26, %s4904_s23  ;;  %2227 = vrot.lane.b32.xlu0 %v2191_v48, %s4909_s30 }
 0x4f7   :  { %2231 = vrot.lane.b32.xlu1 %v2192_v2, %s4907_s26  ;;  %2235 = vrot.lane.b32.xlu0 %v2193_v27, %s4908_s27 }
 0x4fb   :  { %2239 = vrot.lane.b32.xlu1 %v2194_v20, %s4905_s24  ;;  %2243 = vrot.lane.b32.xlu0 %v2195_v49, %s4906_s25  ;;  %v3180_v20 = vcombine.high %v6688_v9, %v6689_v1 }
 0x4fd   :  { %v3194_v62 = vrot.slane %v3180_v20, %v5041_v33 }
 0x4ff   :  { %2247 = vrot.lane.b32.xlu1 %v2196_v47, %s4903_s22  ;;  %2251 = vrot.lane.b32.xlu0 %v2197_v46, %s4904_s23  ;;  %v6690_v46 = vld [vmem:[#allocation27_spill] sm:$0xff] }
 0x500   :  { %v3195_v54 = vcombine.low %v6691_v39, %v6690_v46  ;;  %v3196_v13 = vcombine.high %v6691_v39, %v6690_v46 }
 0x502   :  { %v3203_v0 = vrot.slane %v3195_v54, %v5041_v33  ;;  %v3210_v24 = vrot.slane %v3196_v13, %v5041_v33 }
 0x539   :  { %v4061_v10 = vpop.xlane.xlu0 %4060 }
 0x53d   :  { %v4079_v41 = vpop.xlane.xlu0 %4078 }
 0x53e   :  { %v4064_v29 = vpop.xlane.xlu1 %4063  ;;  %4847 = vrcp.f32 %v4079_v41 }
 0x542   :  { %v4067_v40 = vpop.xlane.xlu0 %4066  ;;  %v4082_v30 = vpop.xlane.xlu1 %4081 }
 0x543   :  { %4849 = vrcp.f32 %v4067_v40 }
 0x544   :  { %4851 = vrcp.f32 %v4061_v10  ;;  %v3259_v10 = vcombine.low %v3194_v62, %v3210_v24 }
 0x546   :  { %v4091_v43 = vpop.xlane.xlu0 %4090  ;;  %v4070_v55 = vpop.xlane.xlu1 %4069  ;;  %v3267_v46 = vrot.slane %v3259_v10, %v5050_v45 }
 0x54a   :  { %v4073_v63 = vpop.xlane.xlu0 %4072 }
 0x54b   :  { %4853 = vrcp.f32 %v4073_v63  ;;  %v4094_v52 = vpop.xlane.xlu1 %4093  ;;  %v4848_v16 = vpop.eup %4847  ;;  %v3260_v63 = vcombine.high %v3194_v62, %v3210_v24 }
 0x54c   :  { %4855 = vrcp.f32 %v4091_v43  ;;  %v4145_v27 = vmul.f32 %v4848_v16, %v6251_v4 }
 0x54e   :  { %v4103_v26 = vpop.xlane.xlu0 %4102 }
 0x54f   :  { %4857 = vrcp.f32 %v4103_v26  ;;  %v4076_v48 = vpop.xlane.xlu1 %4075 }
 0x550   :  { %v4850_v2 = vpop.eup %4849 }
 0x551   :  { %v4141_v19 = vmul.f32 %v4850_v2, %v6276_v56  ;;  %v4852_v4 = vpop.eup %4851  ;;  %v3187_v56 = vrot.slane %v3179_v61, %v5041_v33 }
 0x552   :  { %v4085_v8 = vpop.xlane.xlu0 %4084  ;;  %v4139_v34 = vmul.f32 %v4852_v4, %v6221_v25 }
 0x553   :  { %4859 = vrcp.f32 %v4085_v8  ;;  %v4106_v49 = vpop.xlane.xlu1 %4105  ;;  %v4171_v36 = vcombine.low %v4141_v19, %v4145_v27  ;;  %v4172_v47 = vcombine.high %v4141_v19, %v4145_v27  ;;  %v3243_v32 = vcombine.low %v3187_v56, %v3203_v0 }
 0x554   :  { %4861 = vrcp.f32 %v4064_v29  ;;  %v3244_v11 = vcombine.high %v3187_v56, %v3203_v0 }
 0x555   :  { %v4179_v25 = vrot.slane %v4171_v36, %v5041_v33  ;;  %v3251_v36 = vrot.slane %v3243_v32, %v5050_v45 }
 0x556   :  { %v4097_v18 = vpop.xlane.xlu0 %4096 }
 0x557   :  { %4863 = vrcp.f32 %v4097_v18  ;;  %v4088_v7 = vpop.xlane.xlu1 %4087  ;;  %v3274_v18 = vrot.slane %v3260_v63, %v5050_v45 }
 0x558   :  { %v4854_v6 = vpop.eup %4853  ;;  %4865 = vrcp.f32 %v4082_v30 }
 0x559   :  { %v4856_v37 = vpop.eup %4855  ;;  %4867 = vrcp.f32 %v4070_v55  ;;  %v4143_v22 = vmul.f32 %v4854_v6, %v6322_v15 }
 0x55a   :  { %4869 = vrcp.f32 %v4094_v52  ;;  %v3041_v9 = vpop.permute.xlu0 %3040  ;;  %v6429_v30 = vmul.f32 %v4856_v37, %v6300_v3  ;;  %v6437_v52 = vrot.slane %v4172_v47, %v5041_v33  ;;  %v3258_v47 = vrot.slane %v3244_v11, %v5050_v45 }
 0x55b   :  { %4871 = vrcp.f32 %v4076_v48  ;;  %v4100_v41 = vpop.xlane.xlu1 %4099  ;;  %v4155_v29 = vcombine.low %v4139_v34, %v4143_v22  ;;  %v4156_v40 = vcombine.high %v4139_v34, %v4143_v22  ;;  %v3227_v16 = vcombine.low %v6408_v23, %v3041_v9 }
 0x55c   :  { %v4858_v43 = vpop.eup %4857  ;;  %4873 = vrcp.f32 %v4106_v49  ;;  %v3228_v26 = vcombine.high %v6408_v23, %v3041_v9 }
 0x55d   :  { %v6433_v55 = vmul.f32 %v4858_v43, %v6337_v50  ;;  %4875 = vrcp.f32 %v4088_v7  ;;  %v4163_v15 = vrot.slane %v4155_v29, %v5041_v33  ;;  %v6442_v3 = vrot.slane %v4156_v40, %v5041_v33 }
 0x55e   :  { %4877 = vrcp.f32 %v4100_v41  ;;  %v2204_v48 = vpop.permute.xlu0 %2203  ;;  %v3235_v39 = vrot.slane %v3227_v16, %v5041_v33  ;;  %v3242_v54 = vrot.slane %v3228_v26, %v5041_v33 }
 0x55f   :  { %v3038_v2 = vpop.permute.xlu1 %3037  ;;  %v4203_v50 = vcombine.low %v6429_v30, %v6433_v55  ;;  %v4219_v27 = vcombine.low %v4163_v15, %v4179_v25  ;;  %v4220_v19 = vcombine.high %v4163_v15, %v4179_v25  ;;  %v4204_v1 = vcombine.high %v6429_v30, %v6433_v55 }
 0x560   :  { %v4860_v61 = vpop.eup %4859  ;;  %v3211_v8 = vcombine.low %v6410_v44, %v3038_v2  ;;  %v3212_v20 = vcombine.high %v6410_v44, %v3038_v2  ;;  %v4235_v23 = vcombine.low %v6442_v3, %v6437_v52  ;;  %v4236_v49 = vcombine.high %v6442_v3, %v6437_v52 }
 0x561   :  { %v4862_v56 = vpop.eup %4861  ;;  %v6465_v62 = vmul.f32 %v4860_v61, %v6347_v21  ;;  %v6475_v21 = vrot.slane %v4203_v50, %v5041_v33  ;;  %v6478_v9 = vrot.slane %v4219_v27, %v5050_v45  ;;  %v6488_v25 = vrot.slane %v4220_v19, %v5050_v45 }
 0x562   :  { %v3219_v13 = vrot.slane %v3211_v8, %v5041_v33  ;;  %v3226_v44 = vrot.slane %v3212_v20, %v5041_v33  ;;  %v6461_v4 = vpop.permute.xlu0 %2211 }
 0x563   :  { %v2200_v7 = vpop.permute.xlu1 %2199 }
 0x564   :  { %v4864_v6 = vpop.eup %4863  ;;  %v3275_v0 = vcombine.low %v3219_v13, %v3235_v39  ;;  %v3276_v37 = vcombine.high %v3219_v13, %v3235_v39  ;;  %v3291_v24 = vcombine.low %v3226_v44, %v3242_v54  ;;  %v3292_v34 = vcombine.high %v3226_v44, %v3242_v54 }
 0x565   :  { %v4866_v22 = vpop.eup %4865  ;;  %v6468_v32 = vmul.f32 %v4864_v6, %v6357_v53  ;;  %v2254_v11 = vsel %vm1085_vm2, %v2054_v28, %v2200_v7 }
 0x566   :  { %v4868_v10 = vpop.eup %4867  ;;  %v3283_v41 = vrot.slane %v3275_v0, %v5050_v45  ;;  %v3290_v29 = vrot.slane %v3276_v37, %v5050_v45  ;;  %v3299_v53 = vrot.slane %v3291_v24, %v5050_v45  ;;  %v3306_v40 = vrot.slane %v3292_v34, %v5050_v45  ;;  %v2220_v43 = vpop.permute.xlu0 %2219 }
 0x567   :  { %v4870_v57 = vpop.eup %4869  ;;  %v2208_v31 = vpop.permute.xlu1 %2207  ;;  %v2256_v28 = vsel %vm2255_vm3, %v2254_v11, %v2204_v48  ;;  %v4187_v63 = vcombine.low %v6465_v62, %v6468_v32  ;;  %v4188_v15 = vcombine.high %v6465_v62, %v6468_v32 }
 0x568   :  { %v4872_v16 = vpop.eup %4871  ;;  %v3307_v26 = vcombine.low %v3251_v36, %v3283_v41  ;;  %v3308_v2 = vcombine.high %v3251_v36, %v3283_v41  ;;  %v3309_v50 = vcombine.low %v3258_v47, %v3290_v29  ;;  %v3310_v27 = vcombine.high %v3258_v47, %v3290_v29 }
 0x569   :  { %v4874_v61 = vpop.eup %4873  ;;  %v3311_v8 = vcombine.low %v3267_v46, %v3299_v53  ;;  %v3312_v20 = vcombine.high %v3267_v46, %v3299_v53  ;;  %v3313_v39 = vcombine.low %v3274_v18, %v3306_v40  ;;  %v3314_v48 = vcombine.high %v3274_v18, %v3306_v40 }
 0x56a   :  { %v4876_v54 = vpop.eup %4875  ;;  %v4124_v13 = vmul.f32 %v6246_v58, %v3307_v26  ;;  %v4126_v44 = vmul.f32 %v6295_v51, %v3308_v2  ;;  %v4128_v19 = vmul.f32 %v6332_v5, %v3309_v50  ;;  %v4130_v7 = vmul.f32 %v6271_v12, %v3310_v27  ;;  %v2228_v6 = vpop.permute.xlu0 %2227 }
 0x56b   :  { %v4878_v0 = vpop.eup %4877  ;;  %v4132_v36 = vmul.f32 %v6352_v59, %v3311_v8  ;;  %v4134_v47 = vmul.f32 %v6317_v60, %v3312_v20  ;;  %v4136_v37 = vmul.f32 %v6362_v38, %v3313_v39  ;;  %v4138_v46 = vmul.f32 %v6342_v17, %v3314_v48  ;;  %v2216_v18 = vpop.permute.xlu1 %2215 }
 0x56c   :  { %v4140_v24 = vmul.f32 %v4862_v56, %v4124_v13  ;;  %v4142_v34 = vmul.f32 %v4868_v10, %v4126_v44  ;;  %v4144_v58 = vmul.f32 %v4872_v16, %v4128_v19  ;;  %v4146_v11 = vmul.f32 %v4866_v22, %v4130_v7 }
 0x56d   :  { %v4148_v51 = vmul.f32 %v4876_v54, %v4132_v36  ;;  %v4150_v41 = vmul.f32 %v4870_v57, %v4134_v47  ;;  %v4152_v5 = vmul.f32 %v4878_v0, %v4136_v37  ;;  %v4154_v29 = vmul.f32 %v4874_v61, %v4138_v46 }
 0x56e   :  { %v2258_v12 = vsel %vm2257_vm4, %v2256_v28, %v2208_v31  ;;  %v2267_v60 = vsel %vm1085_vm2, %v2190_v14, %v2228_v6  ;;  %v4291_v59 = vcombine.low %v4140_v24, %v4144_v58  ;;  %v4307_v38 = vcombine.low %v4142_v34, %v4146_v11  ;;  %v2236_v57 = vpop.permute.xlu0 %2235 }
 0x56f   :  { %v2260_v17 = vsel %vm2259_vm5, %v2258_v12, %v6461_v4  ;;  %v2224_v56 = vpop.permute.xlu1 %2223  ;;  %v4323_v10 = vcombine.low %v4148_v51, %v4152_v5  ;;  %v4339_v53 = vcombine.low %v4150_v41, %v4154_v29  ;;  %v4292_v22 = vcombine.high %v4140_v24, %v4144_v58 }
 0x570   :  { %v2262_v40 = vsel %vm2261_vm6, %v2260_v17, %v2216_v18  ;;  %v4299_v16 = vrot.slane %v4291_v59, %v5041_v33  ;;  %v4315_v31 = vrot.slane %v4307_v38, %v5041_v33  ;;  %v4308_v28 = vcombine.high %v4142_v34, %v4146_v11 }
 0x571   :  { %v2264_v42 = vsel %vm2263_vm7, %v2262_v40, %v2220_v43  ;;  %v4331_v35 = vrot.slane %v4323_v10, %v5041_v33  ;;  %v4347_v14 = vrot.slane %v4339_v53, %v5041_v33  ;;  %v4306_v4 = vrot.slane %v4292_v22, %v5041_v33 }
 0x572   :  { %v2266_v26 = vsel %vm2265_vm8, %v2264_v42, %v2224_v56  ;;  %v4356_v2 = vcombine.high %v4299_v16, %v4315_v31  ;;  %v4355_v50 = vcombine.low %v4299_v16, %v4315_v31  ;;  %v4322_v27 = vrot.slane %v4308_v28, %v5041_v33  ;;  %v2244_v36 = vpop.permute.xlu0 %2243 }
 0x573   :  { %2274 = vst [vmem:[#allocation2] sm:$0xff] %v2266_v26  ;;  %v2232_v61 = vpop.permute.xlu1 %2231  ;;  %v4388_v8 = vcombine.high %v4331_v35, %v4347_v14  ;;  %v4387_v20 = vcombine.low %v4331_v35, %v4347_v14  ;;  %v4324_v39 = vcombine.high %v4148_v51, %v4152_v5  ;;  %v4340_v48 = vcombine.high %v4150_v41, %v4154_v29 }
 0x574   :  { %v2268_v43 = vsel %vm2255_vm3, %v2267_v60, %v2232_v61  ;;  %v4370_v54 = vrot.slane %v4356_v2, %v5050_v45  ;;  %v6519_v13 = vrot.slane %v4355_v50, %v5050_v45  ;;  %v4371_v44 = vcombine.low %v4306_v4, %v4322_v27 }
 0x575   :  { %v4402_v19 = vrot.slane %v4388_v8, %v5050_v45  ;;  %v6523_v7 = vrot.slane %v4387_v20, %v5050_v45  ;;  %v4338_v6 = vrot.slane %v4324_v39, %v5041_v33  ;;  %v4218_v0 = vrot.slane %v4204_v1, %v5041_v33 }
 0x576   :  { %v2269_v47 = vsel %vm2257_vm4, %v2268_v43, %v2236_v57  ;;  %v4354_v37 = vrot.slane %v4340_v48, %v5041_v33  ;;  %v4372_v46 = vcombine.high %v4306_v4, %v4322_v27  ;;  %v4195_v18 = vrot.slane %v4187_v63, %v5041_v33  ;;  %v2252_v56 = vpop.permute.xlu0 %2251 }
 0x577   :  { %v2240_v24 = vpop.permute.xlu1 %2239  ;;  %v4421_v34 = vcombine.low %v4370_v54, %v4402_v19  ;;  %v4420_v58 = vcombine.high %v6519_v13, %v6523_v7  ;;  %v4379_v11 = vrot.slane %v4371_v44, %v5050_v45  ;;  %v4202_v30 = vrot.slane %v4188_v15, %v5041_v33 }
 0x578   :  { %v2270_v55 = vsel %vm2259_vm5, %v2269_v47, %v2240_v24  ;;  %v4403_v1 = vcombine.low %v4338_v6, %v4354_v37  ;;  %v4422_v51 = vcombine.high %v4370_v54, %v4402_v19  ;;  %v4404_v41 = vcombine.high %v4338_v6, %v4354_v37 }
 0x579   :  { %4460 = vrot.lane.b32.xlu1 %v4421_v34, %s4907_s26  ;;  %4456 = vrot.lane.b32.xlu0 %v4420_v58, %s4909_s30  ;;  %v4386_v63 = vrot.slane %v4372_v46, %v5050_v45  ;;  %v4251_v5 = vcombine.low %v4195_v18, %v6475_v21  ;;  %v4252_v29 = vcombine.high %v4195_v18, %v6475_v21 }
 0x57a   :  { %v2271_v12 = vsel %vm2261_vm6, %v2270_v55, %v2244_v36  ;;  %v4411_v62 = vrot.slane %v4403_v1, %v5050_v45  ;;  %v4267_v33 = vcombine.low %v4202_v30, %v4218_v0  ;;  %v4268_v32 = vcombine.high %v4202_v30, %v4218_v0 }
 0x57b   :  { %v2248_v15 = vpop.permute.xlu1 %2247  ;;  %v4418_v60 = vrot.slane %v4404_v41, %v5050_v45  ;;  %v4259_v59 = vrot.slane %v4251_v5, %v5050_v45  ;;  %v4266_v38 = vrot.slane %v4252_v29, %v5050_v45  ;;  %v4419_v17 = vcombine.low %v6519_v13, %v6523_v7 }
 0x57c   :  { %v2272_v10 = vsel %vm2263_vm7, %v2271_v12, %v2248_v15  ;;  %v4423_v21 = vcombine.low %v4379_v11, %v4411_v62  ;;  %v4243_v53 = vrot.slane %v4235_v23, %v5050_v45  ;;  %v4275_v31 = vrot.slane %v4267_v33, %v5050_v45 }
 0x57d   :  { %v2273_v22 = vsel %vm2265_vm8, %v2272_v10, %v2252_v56  ;;  %4464 = vrot.lane.b32.xlu0 %v4422_v51, %s4908_s27  ;;  %v4284_v40 = vcombine.high %v6478_v9, %v4259_v59  ;;  %v4285_v57 = vcombine.low %v6488_v25, %v4266_v38  ;;  %v4286_v16 = vcombine.high %v6488_v25, %v4266_v38 }
 0x57e   :  { %2275 = vst [vmem:[#allocation2 + $0x8] sm:$0xff] %v2273_v22  ;;  %4468 = vrot.lane.b32.xlu1 %v4423_v21, %s4905_s24  ;;  %v4250_v23 = vrot.slane %v4236_v49, %v5050_v45  ;;  %v4282_v28 = vrot.slane %v4268_v32, %v5050_v45  ;;  %v4283_v42 = vcombine.low %v6478_v9, %v4259_v59 }
 0x57f   :  { %v4425_v35 = vcombine.low %v4386_v63, %v4418_v60  ;;  %v4424_v14 = vcombine.high %v4379_v11, %v4411_v62  ;;  %v4287_v4 = vcombine.low %v4243_v53, %v4275_v31  ;;  %v4288_v26 = vcombine.high %v4243_v53, %v4275_v31 }
 0x580   :  { %v4289_v2 = vcombine.low %v4250_v23, %v4282_v28  ;;  %v4290_v25 = vcombine.high %v4250_v23, %v4282_v28  ;;  %v4426_v45 = vcombine.high %v4386_v63, %v4418_v60 }
 0x581   :  { %4472 = vrot.lane.b32.xlu0 %v4424_v14, %s4906_s25 }
 0x582   :  { %4476 = vrot.lane.b32.xlu1 %v4425_v35, %s4903_s22 }
 0x585   :  { %4432 = vrot.lane.b32.xlu0 %v4285_v57, %s4907_s26 }
 0x586   :  { %4428 = vrot.lane.b32.xlu1 %v4284_v40, %s4909_s30 }
 0x589   :  { %4440 = vrot.lane.b32.xlu0 %v4287_v4, %s4905_s24 }
 0x58a   :  { %4436 = vrot.lane.b32.xlu1 %v4286_v16, %s4908_s27 }
 0x58d   :  { %4448 = vrot.lane.b32.xlu0 %v4289_v2, %s4903_s22 }
 0x58e   :  { %4444 = vrot.lane.b32.xlu1 %v4288_v26, %s4906_s25 }
 0x591   :  { %4480 = vrot.lane.b32.xlu0 %v4426_v45, %s4904_s23 }
 0x592   :  { %4452 = vrot.lane.b32.xlu1 %v4290_v25, %s4904_s23 }
 0x5eb   :  { %v4461_v52 = vpop.permute.xlu1 %4460  ;;  %v4457_v3 = vpop.permute.xlu0 %4456 }
 0x5ec   :  { %v4490_v8 = vsel %vm1085_vm2, %v4419_v17, %v4457_v3 }
 0x5ed   :  { %v4491_v48 = vsel %vm2255_vm3, %v4490_v8, %v4461_v52 }
 0x5ef   :  { %v4465_v49 = vpop.permute.xlu0 %4464 }
 0x5f0   :  { %v4469_v9 = vpop.permute.xlu1 %4468  ;;  %v4492_v54 = vsel %vm2257_vm4, %v4491_v48, %v4465_v49 }
 0x5f1   :  { %v4493_v7 = vsel %vm2259_vm5, %v4492_v54, %v4469_v9 }
 0x5f3   :  { %v4473_v50 = vpop.permute.xlu0 %4472 }
 0x5f4   :  { %v4477_v27 = vpop.permute.xlu1 %4476  ;;  %v4494_v0 = vsel %vm2261_vm6, %v4493_v7, %v4473_v50 }
 0x5f5   :  { %v4495_v46 = vsel %vm2263_vm7, %v4494_v0, %v4477_v27 }
 0x5f7   :  { %v4433_v61 = vpop.permute.xlu0 %4432 }
 0x5f8   :  { %v4429_v20 = vpop.permute.xlu1 %4428 }
 0x5f9   :  { %v4483_v39 = vsel %vm1085_vm2, %v4283_v42, %v4429_v20 }
 0x5fa   :  { %v4484_v13 = vsel %vm2255_vm3, %v4483_v39, %v4433_v61 }
 0x5fb   :  { %v4441_v43 = vpop.permute.xlu0 %4440 }
 0x5fc   :  { %v4437_v44 = vpop.permute.xlu1 %4436 }
 0x5fd   :  { %v4485_v19 = vsel %vm2257_vm4, %v4484_v13, %v4437_v44 }
 0x5fe   :  { %v4486_v36 = vsel %vm2259_vm5, %v4485_v19, %v4441_v43 }
 0x5ff   :  { %v4449_v6 = vpop.permute.xlu0 %4448 }
 0x600   :  { %v4445_v47 = vpop.permute.xlu1 %4444 }
 0x601   :  { %v4487_v37 = vsel %vm2261_vm6, %v4486_v36, %v4445_v47 }
 0x602   :  { %v4488_v24 = vsel %vm2263_vm7, %v4487_v37, %v4449_v6 }
 0x603   :  { %v4481_v18 = vpop.permute.xlu0 %4480 }
 0x604   :  { %v4453_v34 = vpop.permute.xlu1 %4452  ;;  %v4496_v58 = vsel %vm2265_vm8, %v4495_v46, %v4481_v18 }
 0x605   :  { %v4489_v11 = vsel %vm2265_vm8, %v4488_v24, %v4453_v34  ;;  %4499 = vst [vmem:[#allocation2 + $0x18] sm:$0xff] %v4496_v58 }
 0x606   :  { %4498 = vst [vmem:[#allocation2 + $0x10] sm:$0xff] %v4489_v11 }
 0x607   :  { %4890 = shalt.err (!%p4887_p4)
}
 0x608   :  { %s4913_s8 = smov 256  }
 0x609   :  { %4511 = dma.vmem_to_hbm [thread:$0]  %s4506_s6, 512, %s6605_s3, [#allocation3], %s4913_s8, %s4913_s8, %s4909_s30  }
 0x60a   :  { %4899 = dma.done.wait [#allocation3], 512  }
 0x60b   :  { %4900 = vsyncadd [#allocation3], 4294966784 }
 0x60c   :  { %4515 = vsyncpa [#allocation3], 1 }

</bundles_post_ra>
